<compile_context>
chip_gen: v7x
topology: tpu7x:2x2x1
jax: 0.10.0
libtpu: 0.0.40
codegen_flags: <defaults>
</compile_context>

<pallas_src>
import functools

import jax
import jax.numpy as jnp
from jax.experimental import pallas as pl
from jax.experimental.pallas import tpu as pltpu


# -----------------------------------------------------------------------------
# Kernel
# -----------------------------------------------------------------------------
def _intervention_attn_kernel(x_ref, wq_ref, bq_ref, wkv_ref, bkv_ref,
                              wo_ref, bo_ref, o_ref, kv_scratch,
                              *, n_heads, d_k, tq, l_real):
    D = n_heads * d_k
    L_pad = x_ref.shape[1]
    qi = pl.program_id(1)

    # ---- K|V projection for the whole (padded) sequence, once per batch elem.
    # One fused (L, D) x (D, 2D) MXU pass, cached as bf16 in VMEM and reused by
    # every query tile of this batch element.
    @pl.when(qi == 0)
    def _():
        x_full = x_ref[0]                                           # (L_pad, D) bf16
        kv = jnp.dot(x_full, wkv_ref[...],
                     preferred_element_type=jnp.float32) + bkv_ref[...]
        # Intervention folded into V: combined = probs * (0.5 on key column 0),
        # and (probs * colscale) @ V == probs @ (diag(colscale) @ V), so halve
        # V's row 0 once here instead of scaling (tq, L) probs per head/tile.
        row = jax.lax.broadcasted_iota(jnp.int32, (L_pad, 1), 0)
        col = jax.lax.broadcasted_iota(jnp.int32, (1, 2 * D), 1)
        v_scale = jnp.where((row == 0) & (col >= D), 0.5, 1.0).astype(jnp.float32)
        kv_scratch[...] = (kv * v_scale).astype(jnp.bfloat16)       # (L_pad, 2D)

    # ---- Q projection for this query tile (sliced from the resident block;
    # x is read from HBM only once).
    q_start = pl.multiple_of(qi * tq, tq)
    x_q = x_ref[0, pl.ds(q_start, tq), :]                           # (tq, D) bf16
    q = jnp.dot(x_q, wq_ref[...],
                preferred_element_type=jnp.float32) + bq_ref[...]   # (tq, D) f32
    # 1/sqrt(d_k) applied once to the (tq, D) q (not per-head on (tq, L) scores);
    # cast to bf16 once and slice bf16 per head.
    q = (q * (1.0 / (float(d_k) ** 0.5))).astype(jnp.bfloat16)

    # Key-padding mask — only emitted when the sequence was padded.
    if l_real < L_pad:
        col = jax.lax.broadcasted_iota(jnp.int32, (1, L_pad), 1)
        key_mask = jnp.where(col < l_real, 0.0, -1e30).astype(jnp.float32)
    else:
        key_mask = None

    head_outs = []
    for h in range(n_heads):                     # static unroll (small n_heads)
        qh = q[:, h * d_k:(h + 1) * d_k]                            # (tq, d_k)  bf16
        kh = kv_scratch[:, h * d_k:(h + 1) * d_k]                   # (L_pad, d_k) bf16
        vh = kv_scratch[:, D + h * d_k:D + (h + 1) * d_k]           # (L_pad, d_k) bf16

        # Contract last dims of both operands -> no explicit K transpose.
        scores = jax.lax.dot_general(
            qh, kh, (((1,), (1,)), ((), ())),
            preferred_element_type=jnp.float32)                     # (tq, L_pad) f32
        if key_mask is not None:
            scores = scores + key_mask

        # Max-stabilized softmax; the 1/sum normalization is deferred to the
        # small (tq, d_k) head output (removes a (tq, L) VPU pass per head).
        m = jnp.max(scores, axis=-1, keepdims=True)
        e = jnp.exp(scores - m)
        s = jnp.sum(e, axis=-1, keepdims=True)
        head_out = jnp.dot(e.astype(jnp.bfloat16), vh,
                           preferred_element_type=jnp.float32)      # (tq, d_k)
        head_out = head_out * pl.reciprocal(s, approx=True)
        head_outs.append(head_out.astype(jnp.bfloat16))

    # Single full-depth output projection: (tq, D) @ (D, D) fills the MXU's
    # contraction depth instead of n_heads K=d_k matmuls.
    merged = jnp.concatenate(head_outs, axis=-1) if n_heads > 1 else head_outs[0]
    y = jnp.dot(merged, wo_ref[...],
                preferred_element_type=jnp.float32) + bo_ref[...]

    # TODO(synk): dropout omitted (eval-mode identity).
    o_ref[0] = y.astype(o_ref.dtype)


# -----------------------------------------------------------------------------
# Wrapper
# -----------------------------------------------------------------------------
def _vmem_capacity_bytes():
    try:
        return int(pltpu.get_tpu_info().vmem_capacity_bytes)
    except Exception:
        return 128 * 1024 * 1024   # v5e/v6e default assumption


def _pick_tq(L_pad, vmem_cap):
    if L_pad <= 256:
        return L_pad                       # single tile; full-dim block is legal
    # v7x (64 MiB VMEM) -> smaller query tiles; v5e/v6e (128 MiB) -> 256.
    prefer = (128, 256) if vmem_cap <= 64 * 1024 * 1024 else (256, 128)
    for t in prefer:
        if L_pad % t == 0:
            return t
    return 128                             # L_pad is a multiple of 128 by construction


def _as_row(b):
    return jnp.asarray(b, jnp.float32).reshape(1, -1)


def prepare_params(params):
    """One-time weight fusion + bf16 cast (hoisted out of the per-call hot path)."""
    return dict(
        w_q=params["W_q"].astype(jnp.bfloat16),
        w_kv=jnp.concatenate([params["W_k"], params["W_v"]], axis=1).astype(jnp.bfloat16),
        w_o=params["W_o"].astype(jnp.bfloat16),
        b_q=_as_row(params["b_q"]),
        b_kv=jnp.concatenate([_as_row(params["b_k"]), _as_row(params["b_v"])], axis=1),
        b_o=_as_row(params["b_o"]),
    )


_SINGLE_BUFFER_WEIGHTS = [None]   # resolved on first call (True/False)
_CONST_MAP = lambda b, qi: (0, 0)


def _weight_specs(D, single_buffer):
    # Constant-index weights/biases: single-buffer them (nothing to prefetch
    # after the first fetch), halving their VMEM footprint.
    kw = dict(pipeline_mode=pl.Buffered(1)) if single_buffer else {}
    return [
        pl.BlockSpec((D, D), _CONST_MAP, **kw),        # W_q (bf16)
        pl.BlockSpec((1, D), _CONST_MAP, **kw),        # b_q
        pl.BlockSpec((D, 2 * D), _CONST_MAP, **kw),    # W_k|W_v fused (bf16)
        pl.BlockSpec((1, 2 * D), _CONST_MAP, **kw),    # b_k|b_v fused
        pl.BlockSpec((D, D), _CONST_MAP, **kw),        # W_o (bf16)
        pl.BlockSpec((1, D), _CONST_MAP, **kw),        # b_o
    ]


def _run(x_bf, prep, n_heads, d_k, l_real, tq, out_dtype, single_buffer, vmem_limit):
    B, L_pad, D = x_bf.shape
    nq = L_pad // tq
    kernel = functools.partial(_intervention_attn_kernel,
                               n_heads=n_heads, d_k=d_k, tq=tq, l_real=l_real)
    return pl.pallas_call(
        kernel,
        out_shape=jax.ShapeDtypeStruct((B, L_pad, D), out_dtype),
        grid_spec=pltpu.PrefetchScalarGridSpec(
            num_scalar_prefetch=0,
            grid=(B, nq),
            in_specs=[pl.BlockSpec((1, L_pad, D), lambda b, qi: (b, 0, 0))]  # x (bf16)
                     + _weight_specs(D, single_buffer),
            out_specs=pl.BlockSpec((1, tq, D), lambda b, qi: (b, qi, 0)),
            scratch_shapes=[pltpu.VMEM((L_pad, 2 * D), jnp.bfloat16)],        # cached K|V
        ),
        compiler_params=pltpu.CompilerParams(
            # TODO(synk): on v7x with B < num cores, K|V could be precomputed in a
            # separate call so the qi axis can also be marked 'parallel'.
            dimension_semantics=("parallel", "arbitrary"),
            vmem_limit_bytes=vmem_limit),
    )(x_bf, prep["w_q"], prep["b_q"], prep["w_kv"], prep["b_kv"],
      prep["w_o"], prep["b_o"])


def interventional_attention(x, prep, n_heads):
    """x: (B, L, D) float32. prep: output of prepare_params()."""
    B, L, D = x.shape
    assert D % n_heads == 0, "d_model must be divisible by n_heads"
    d_k = D // n_heads

    # Pad L to a lane-friendly multiple of 128 (padded keys masked in-kernel,
    # padded query rows sliced off below). Small L uses a full-dim block.
    L_pad = L if L <= 128 else ((L + 127) // 128) * 128
    x_bf = x.astype(jnp.bfloat16)            # bf16 activations: halves x DMA/VMEM
    if L_pad != L:
        x_bf = jnp.pad(x_bf, ((0, 0), (0, L_pad - L), (0, 0)))

    cap = _vmem_capacity_bytes()
    tq = _pick_tq(L_pad, cap)

    # VMEM budget estimate: x block (2-buf, bf16) + kv scratch + single-buffered
    # bf16 weights + output block (2-buf, f32) + softmax temporaries + headroom.
    est = (2 * L_pad * D * 2 + L_pad * 2 * D * 2 + 8 * D * D
           + 2 * tq * D * 4 + 4 * tq * L_pad * 4 + (2 << 20))
    vmem_limit = int(min(cap * 3 // 4, max(32 << 20, int(est * 1.5))))

    modes = ([True, False] if _SINGLE_BUFFER_WEIGHTS[0] is None
             else [_SINGLE_BUFFER_WEIGHTS[0]])
    err = None
    for single in modes:
        try:
            out = _run(x_bf, prep, n_heads, d_k, L, tq, x.dtype, single, vmem_limit)
            _SINGLE_BUFFER_WEIGHTS[0] = single
            return out[:, :L, :]
        except Exception as e:   # fall back to default double-buffered weights
            err = e
    raise err


# -----------------------------------------------------------------------------
# Pure-JAX f32 reference (mirrors the PyTorch forward, dropout = identity)
# -----------------------------------------------------------------------------
def _reference(x, params, n_heads):
    B, L, D = x.shape
    d_k = D // n_heads

    def proj(w, b):
        return x @ w + jnp.reshape(b, (1, 1, -1))

    def split_heads(t):
        return t.reshape(B, L, n_heads, d_k).transpose(0, 2, 1, 3)

    Q = split_heads(proj(params["W_q"], params["b_q"]))
    K = split_heads(proj(params["W_k"], params["b_k"]))
    V = split_heads(proj(params["W_v"], params["b_v"]))

    scores = jnp.einsum("bhqd,bhkd->bhqk", Q, K) / (d_k ** 0.5)
    probs = jax.nn.softmax(scores, axis=-1)
    intervened = probs.at[:, :, :, 0].set(0.0)
    combined = probs + 0.5 * (intervened - probs)
    out = jnp.einsum("bhqk,bhkd->bhqd", combined, V)
    out = out.transpose(0, 2, 1, 3).reshape(B, L, D)
    return out @ params["W_o"] + jnp.reshape(params["b_o"], (1, 1, -1))


if __name__ == "__main__":
    key = jax.random.PRNGKey(0)

    def make_params(k, D):
        ks = jax.random.split(k, 8)

        def lin(kw, kb):
            # PyTorch nn.Linear weight is (out, in); we store the transpose
            # (in, out) so projections are x @ W + b.
            w = jax.random.normal(kw, (D, D), jnp.float32) * (1.0 / D ** 0.5)
            b = jax.random.normal(kb, (1, D), jnp.float32) * 0.01
            return w, b

        Wq, bq = lin(ks[0], ks[1]); Wk, bk = lin(ks[2], ks[3])
        Wv, bv = lin(ks[4], ks[5]); Wo, bo = lin(ks[6], ks[7])
        return dict(W_q=Wq, b_q=bq, W_k=Wk, b_k=bk,
                    W_v=Wv, b_v=bv, W_o=Wo, b_o=bo)

    k1, k2, k3, k4 = jax.random.split(key, 4)

    # Case 1: small shapes consistent with the module (B=2, L=8, D=32, H=4).
    B, L, D, n_heads = 2, 8, 32, 4
    params = make_params(k1, D)
    prep = prepare_params(params)
    x = jax.random.normal(k2, (B, L, D), jnp.float32)
    out = jax.block_until_ready(interventional_attention(x, prep, n_heads))
    ref = _reference(x, params, n_heads)
    assert out.shape == (B, L, D)
    assert jnp.allclose(out, ref, atol=5e-2, rtol=5e-2), "mismatch vs reference (small case)"

    # Case 2: exercises query tiling (nq > 1), the qi>0 K|V reuse path, and the
    # non-128-aligned L padding/masking path.
    B2, L2, D2, n_heads2 = 1, 300, 256, 2
    params2 = make_params(k3, D2)
    prep2 = prepare_params(params2)
    x2 = jax.random.normal(k4, (B2, L2, D2), jnp.float32)
    out2 = jax.block_until_ready(interventional_attention(x2, prep2, n_heads2))
    ref2 = _reference(x2, params2, n_heads2)
    assert out2.shape == (B2, L2, D2)
    assert jnp.allclose(out2, ref2, atol=5e-2, rtol=5e-2), "mismatch vs reference (tiled case)"

    print("KERNEL_OK")
</pallas_src>

<mosaic_0001>
module attributes {stable_mosaic.version = 11 : i64} {
  func.func @_intervention_attn_kernel(%arg0: i32, %arg1: i32, %arg2: memref<1x8x32xbf16, #tpu.memory_space<vmem>>, %arg3: memref<32x32xbf16, #tpu.memory_space<vmem>>, %arg4: memref<1x32xf32, #tpu.memory_space<vmem>>, %arg5: memref<32x64xbf16, #tpu.memory_space<vmem>>, %arg6: memref<1x64xf32, #tpu.memory_space<vmem>>, %arg7: memref<32x32xbf16, #tpu.memory_space<vmem>>, %arg8: memref<1x32xf32, #tpu.memory_space<vmem>>, %arg9: memref<1x8x32xf32, #tpu.memory_space<vmem>>, %arg10: memref<8x64xbf16, #tpu.memory_space<vmem>>) attributes {dimension_semantics = [#tpu.dimension_semantics<parallel>, #tpu.dimension_semantics<arbitrary>], iteration_bounds = array<i64: 2, 1>, scalar_prefetch = 0 : i64, scratch_operands = 1 : i64, tpu.core_type = #tpu.core_type<tc>, window_params = [{transform_indices = @transform_0, window_bounds = array<i64: 1, 8, 32>}, {pipeline_mode = #tpu.pipeline_mode<synchronous>, transform_indices = @transform_1, window_bounds = array<i64: 32, 32>}, {pipeline_mode = #tpu.pipeline_mode<synchronous>, transform_indices = @transform_2, window_bounds = array<i64: 1, 32>}, {pipeline_mode = #tpu.pipeline_mode<synchronous>, transform_indices = @transform_3, window_bounds = array<i64: 32, 64>}, {pipeline_mode = #tpu.pipeline_mode<synchronous>, transform_indices = @transform_4, window_bounds = array<i64: 1, 64>}, {pipeline_mode = #tpu.pipeline_mode<synchronous>, transform_indices = @transform_5, window_bounds = array<i64: 32, 32>}, {pipeline_mode = #tpu.pipeline_mode<synchronous>, transform_indices = @transform_6, window_bounds = array<i64: 1, 32>}, {transform_indices = @transform_7, window_bounds = array<i64: 1, 8, 32>}]} {
    %c0_i32 = arith.constant 0 : i32
    %0 = arith.cmpi eq, %arg1, %c0_i32 : i32
    %1 = arith.extui %0 : i1 to i32
    %c0_i32_0 = arith.constant 0 : i32
    %2 = arith.cmpi ne, %1, %c0_i32_0 : i32
    scf.if %2 {
      %c0_40 = arith.constant 0 : index
      %c0_41 = arith.constant 0 : index
      %c0_42 = arith.constant 0 : index
      %93 = vector.load %arg2[%c0_40, %c0_41, %c0_42] : memref<1x8x32xbf16, #tpu.memory_space<vmem>>, vector<1x8x32xbf16>
      %94 = vector.shape_cast %93 : vector<1x8x32xbf16> to vector<8x32xbf16>
      %c0_43 = arith.constant 0 : index
      %c0_44 = arith.constant 0 : index
      %95 = vector.load %arg5[%c0_43, %c0_44] : memref<32x64xbf16, #tpu.memory_space<vmem>>, vector<32x64xbf16>
      %cst_45 = arith.constant dense<0.000000e+00> : vector<8x64xf32>
      %96 = tpu.matmul %94, %95, %cst_45 {dimension_numbers = #tpu.dot_dimension_numbers<[1], [0], [0], [1], [0, 0, 1, 1], [], []>} : vector<8x32xbf16>, vector<32x64xbf16>, vector<8x64xf32> -> vector<8x64xf32>
      %c0_46 = arith.constant 0 : index
      %c0_47 = arith.constant 0 : index
      %97 = vector.load %arg6[%c0_46, %c0_47] : memref<1x64xf32, #tpu.memory_space<vmem>>, vector<1x64xf32>
      %98 = vector.broadcast %97 : vector<1x64xf32> to vector<8x64xf32>
      %99 = arith.addf %96, %98 : vector<8x64xf32>
      %100 = tpu.iota {dimensions = array<i32: 0>} : vector<8x1xi32>
      %101 = tpu.iota {dimensions = array<i32: 1>} : vector<1x64xi32>
      %c0_i32_48 = arith.constant 0 : i32
      %102 = vector.broadcast %c0_i32_48 : i32 to vector<8x1xi32>
      %103 = arith.cmpi eq, %100, %102 : vector<8x1xi32>
      %c32_i32 = arith.constant 32 : i32
      %104 = vector.broadcast %c32_i32 : i32 to vector<1x64xi32>
      %105 = arith.cmpi sge, %101, %104 : vector<1x64xi32>
      %106 = vector.broadcast %103 : vector<8x1xi1> to vector<8x64xi1>
      %107 = vector.broadcast %105 : vector<1x64xi1> to vector<8x64xi1>
      %108 = arith.andi %106, %107 : vector<8x64xi1>
      %cst_49 = arith.constant 5.000000e-01 : f32
      %cst_50 = arith.constant 1.000000e+00 : f32
      %109 = vector.broadcast %cst_49 : f32 to vector<8x64xf32>
      %110 = vector.broadcast %cst_50 : f32 to vector<8x64xf32>
      %111 = arith.select %108, %109, %110 : vector<8x64xi1>, vector<8x64xf32>
      %112 = arith.mulf %99, %111 : vector<8x64xf32>
      %113 = arith.truncf %112 : vector<8x64xf32> to vector<8x64xbf16>
      %c0_51 = arith.constant 0 : index
      %c0_52 = arith.constant 0 : index
      %114 = vector.load %arg10[%c0_51, %c0_52] : memref<8x64xbf16, #tpu.memory_space<vmem>>, vector<8x64xbf16>
      tpu.vector_store %arg10[%c0_51, %c0_52], %113 {strides = array<i32>} : memref<8x64xbf16, #tpu.memory_space<vmem>>, vector<8x64xbf16>,
    } else {
    }
    %c8_i32 = arith.constant 8 : i32
    %3 = arith.muli %arg1, %c8_i32 : i32
    %4 = tpu.assume_multiple %3, 8 : i32
    %c0 = arith.constant 0 : index
    %5 = arith.index_cast %4 : i32 to index
    %c0_1 = arith.constant 0 : index
    %6 = vector.load %arg2[%c0, %5, %c0_1] : memref<1x8x32xbf16, #tpu.memory_space<vmem>>, vector<1x8x32xbf16>
    %7 = vector.shape_cast %6 : vector<1x8x32xbf16> to vector<8x32xbf16>
    %c0_2 = arith.constant 0 : index
    %c0_3 = arith.constant 0 : index
    %8 = vector.load %arg3[%c0_2, %c0_3] : memref<32x32xbf16, #tpu.memory_space<vmem>>, vector<32x32xbf16>
    %cst = arith.constant dense<0.000000e+00> : vector<8x32xf32>
    %9 = tpu.matmul %7, %8, %cst {dimension_numbers = #tpu.dot_dimension_numbers<[1], [0], [0], [1], [0, 0, 1, 1], [], []>} : vector<8x32xbf16>, vector<32x32xbf16>, vector<8x32xf32> -> vector<8x32xf32>
    %c0_4 = arith.constant 0 : index
    %c0_5 = arith.constant 0 : index
    %10 = vector.load %arg4[%c0_4, %c0_5] : memref<1x32xf32, #tpu.memory_space<vmem>>, vector<1x32xf32>
    %11 = vector.broadcast %10 : vector<1x32xf32> to vector<8x32xf32>
    %12 = arith.addf %9, %11 : vector<8x32xf32>
    %cst_6 = arith.constant 0.353553385 : f32
    %13 = vector.broadcast %cst_6 : f32 to vector<8x32xf32>
    %14 = arith.mulf %12, %13 : vector<8x32xf32>
    %15 = arith.truncf %14 : vector<8x32xf32> to vector<8x32xbf16>
    %16 = vector.extract_strided_slice %15 {offsets = [0, 0], sizes = [8, 8], strides = [1, 1]} : vector<8x32xbf16> to vector<8x8xbf16>
    %c0_7 = arith.constant 0 : index
    %c0_8 = arith.constant 0 : index
    %17 = vector.load %arg10[%c0_7, %c0_8] : memref<8x64xbf16, #tpu.memory_space<vmem>>, vector<8x8xbf16>
    %c0_9 = arith.constant 0 : index
    %c32 = arith.constant 32 : index
    %18 = vector.load %arg10[%c0_9, %c32] : memref<8x64xbf16, #tpu.memory_space<vmem>>, vector<8x8xbf16>
    %cst_10 = arith.constant dense<0.000000e+00> : vector<8x8xf32>
    %19 = tpu.matmul %16, %17, %cst_10 {dimension_numbers = #tpu.dot_dimension_numbers<[1], [1], [0], [0], [0, 0, 1, 0], [], []>} : vector<8x8xbf16>, vector<8x8xbf16>, vector<8x8xf32> -> vector<8x8xf32>
    %cst_11 = arith.constant dense<0xFF800000> : vector<8xf32>
    %20 = vector.multi_reduction <maximumf>, %19, %cst_11 [1] : vector<8x8xf32> to vector<8xf32>
    %21 = vector.shape_cast %20 : vector<8xf32> to vector<8x1xf32>
    %22 = vector.broadcast %21 : vector<8x1xf32> to vector<8x8xf32>
    %23 = arith.subf %19, %22 : vector<8x8xf32>
    %24 = math.exp %23 : vector<8x8xf32>
    %cst_12 = arith.constant dense<0.000000e+00> : vector<8xf32>
    %25 = vector.multi_reduction <add>, %24, %cst_12 [1] : vector<8x8xf32> to vector<8xf32>
    %26 = vector.shape_cast %25 : vector<8xf32> to vector<8x1xf32>
    %27 = arith.truncf %24 : vector<8x8xf32> to vector<8x8xbf16>
    %cst_13 = arith.constant dense<0.000000e+00> : vector<8x8xf32>
    %28 = tpu.matmul %27, %18, %cst_13 {dimension_numbers = #tpu.dot_dimension_numbers<[1], [0], [0], [1], [0, 0, 1, 1], [], []>} : vector<8x8xbf16>, vector<8x8xbf16>, vector<8x8xf32> -> vector<8x8xf32>
    %29 = tpu.reciprocal %26 {approx = true} : vector<8x1xf32> -> vector<8x1xf32>
    %30 = vector.broadcast %29 : vector<8x1xf32> to vector<8x8xf32>
    %31 = arith.mulf %28, %30 : vector<8x8xf32>
    %32 = arith.truncf %31 : vector<8x8xf32> to vector<8x8xbf16>
    %33 = vector.extract_strided_slice %15 {offsets = [0, 8], sizes = [8, 8], strides = [1, 1]} : vector<8x32xbf16> to vector<8x8xbf16>
    %c0_14 = arith.constant 0 : index
    %c8 = arith.constant 8 : index
    %34 = vector.load %arg10[%c0_14, %c8] : memref<8x64xbf16, #tpu.memory_space<vmem>>, vector<8x8xbf16>
    %c0_15 = arith.constant 0 : index
    %c40 = arith.constant 40 : index
    %35 = vector.load %arg10[%c0_15, %c40] : memref<8x64xbf16, #tpu.memory_space<vmem>>, vector<8x8xbf16>
    %cst_16 = arith.constant dense<0.000000e+00> : vector<8x8xf32>
    %36 = tpu.matmul %33, %34, %cst_16 {dimension_numbers = #tpu.dot_dimension_numbers<[1], [1], [0], [0], [0, 0, 1, 0], [], []>} : vector<8x8xbf16>, vector<8x8xbf16>, vector<8x8xf32> -> vector<8x8xf32>
    %cst_17 = arith.constant dense<0xFF800000> : vector<8xf32>
    %37 = vector.multi_reduction <maximumf>, %36, %cst_17 [1] : vector<8x8xf32> to vector<8xf32>
    %38 = vector.shape_cast %37 : vector<8xf32> to vector<8x1xf32>
    %39 = vector.broadcast %38 : vector<8x1xf32> to vector<8x8xf32>
    %40 = arith.subf %36, %39 : vector<8x8xf32>
    %41 = math.exp %40 : vector<8x8xf32>
    %cst_18 = arith.constant dense<0.000000e+00> : vector<8xf32>
    %42 = vector.multi_reduction <add>, %41, %cst_18 [1] : vector<8x8xf32> to vector<8xf32>
    %43 = vector.shape_cast %42 : vector<8xf32> to vector<8x1xf32>
    %44 = arith.truncf %41 : vector<8x8xf32> to vector<8x8xbf16>
    %cst_19 = arith.constant dense<0.000000e+00> : vector<8x8xf32>
    %45 = tpu.matmul %44, %35, %cst_19 {dimension_numbers = #tpu.dot_dimension_numbers<[1], [0], [0], [1], [0, 0, 1, 1], [], []>} : vector<8x8xbf16>, vector<8x8xbf16>, vector<8x8xf32> -> vector<8x8xf32>
    %46 = tpu.reciprocal %43 {approx = true} : vector<8x1xf32> -> vector<8x1xf32>
    %47 = vector.broadcast %46 : vector<8x1xf32> to vector<8x8xf32>
    %48 = arith.mulf %45, %47 : vector<8x8xf32>
    %49 = arith.truncf %48 : vector<8x8xf32> to vector<8x8xbf16>
    %50 = vector.extract_strided_slice %15 {offsets = [0, 16], sizes = [8, 8], strides = [1, 1]} : vector<8x32xbf16> to vector<8x8xbf16>
    %c0_20 = arith.constant 0 : index
    %c16 = arith.constant 16 : index
    %51 = vector.load %arg10[%c0_20, %c16] : memref<8x64xbf16, #tpu.memory_space<vmem>>, vector<8x8xbf16>
    %c0_21 = arith.constant 0 : index
    %c48 = arith.constant 48 : index
    %52 = vector.load %arg10[%c0_21, %c48] : memref<8x64xbf16, #tpu.memory_space<vmem>>, vector<8x8xbf16>
    %cst_22 = arith.constant dense<0.000000e+00> : vector<8x8xf32>
    %53 = tpu.matmul %50, %51, %cst_22 {dimension_numbers = #tpu.dot_dimension_numbers<[1], [1], [0], [0], [0, 0, 1, 0], [], []>} : vector<8x8xbf16>, vector<8x8xbf16>, vector<8x8xf32> -> vector<8x8xf32>
    %cst_23 = arith.constant dense<0xFF800000> : vector<8xf32>
    %54 = vector.multi_reduction <maximumf>, %53, %cst_23 [1] : vector<8x8xf32> to vector<8xf32>
    %55 = vector.shape_cast %54 : vector<8xf32> to vector<8x1xf32>
    %56 = vector.broadcast %55 : vector<8x1xf32> to vector<8x8xf32>
    %57 = arith.subf %53, %56 : vector<8x8xf32>
    %58 = math.exp %57 : vector<8x8xf32>
    %cst_24 = arith.constant dense<0.000000e+00> : vector<8xf32>
    %59 = vector.multi_reduction <add>, %58, %cst_24 [1] : vector<8x8xf32> to vector<8xf32>
    %60 = vector.shape_cast %59 : vector<8xf32> to vector<8x1xf32>
    %61 = arith.truncf %58 : vector<8x8xf32> to vector<8x8xbf16>
    %cst_25 = arith.constant dense<0.000000e+00> : vector<8x8xf32>
    %62 = tpu.matmul %61, %52, %cst_25 {dimension_numbers = #tpu.dot_dimension_numbers<[1], [0], [0], [1], [0, 0, 1, 1], [], []>} : vector<8x8xbf16>, vector<8x8xbf16>, vector<8x8xf32> -> vector<8x8xf32>
    %63 = tpu.reciprocal %60 {approx = true} : vector<8x1xf32> -> vector<8x1xf32>
    %64 = vector.broadcast %63 : vector<8x1xf32> to vector<8x8xf32>
    %65 = arith.mulf %62, %64 : vector<8x8xf32>
    %66 = arith.truncf %65 : vector<8x8xf32> to vector<8x8xbf16>
    %67 = vector.extract_strided_slice %15 {offsets = [0, 24], sizes = [8, 8], strides = [1, 1]} : vector<8x32xbf16> to vector<8x8xbf16>
    %c0_26 = arith.constant 0 : index
    %c24 = arith.constant 24 : index
    %68 = vector.load %arg10[%c0_26, %c24] : memref<8x64xbf16, #tpu.memory_space<vmem>>, vector<8x8xbf16>
    %c0_27 = arith.constant 0 : index
    %c56 = arith.constant 56 : index
    %69 = vector.load %arg10[%c0_27, %c56] : memref<8x64xbf16, #tpu.memory_space<vmem>>, vector<8x8xbf16>
    %cst_28 = arith.constant dense<0.000000e+00> : vector<8x8xf32>
    %70 = tpu.matmul %67, %68, %cst_28 {dimension_numbers = #tpu.dot_dimension_numbers<[1], [1], [0], [0], [0, 0, 1, 0], [], []>} : vector<8x8xbf16>, vector<8x8xbf16>, vector<8x8xf32> -> vector<8x8xf32>
    %cst_29 = arith.constant dense<0xFF800000> : vector<8xf32>
    %71 = vector.multi_reduction <maximumf>, %70, %cst_29 [1] : vector<8x8xf32> to vector<8xf32>
    %72 = vector.shape_cast %71 : vector<8xf32> to vector<8x1xf32>
    %73 = vector.broadcast %72 : vector<8x1xf32> to vector<8x8xf32>
    %74 = arith.subf %70, %73 : vector<8x8xf32>
    %75 = math.exp %74 : vector<8x8xf32>
    %cst_30 = arith.constant dense<0.000000e+00> : vector<8xf32>
    %76 = vector.multi_reduction <add>, %75, %cst_30 [1] : vector<8x8xf32> to vector<8xf32>
    %77 = vector.shape_cast %76 : vector<8xf32> to vector<8x1xf32>
    %78 = arith.truncf %75 : vector<8x8xf32> to vector<8x8xbf16>
    %cst_31 = arith.constant dense<0.000000e+00> : vector<8x8xf32>
    %79 = tpu.matmul %78, %69, %cst_31 {dimension_numbers = #tpu.dot_dimension_numbers<[1], [0], [0], [1], [0, 0, 1, 1], [], []>} : vector<8x8xbf16>, vector<8x8xbf16>, vector<8x8xf32> -> vector<8x8xf32>
    %80 = tpu.reciprocal %77 {approx = true} : vector<8x1xf32> -> vector<8x1xf32>
    %81 = vector.broadcast %80 : vector<8x1xf32> to vector<8x8xf32>
    %82 = arith.mulf %79, %81 : vector<8x8xf32>
    %83 = arith.truncf %82 : vector<8x8xf32> to vector<8x8xbf16>
    %84 = tpu.concatenate %32, %49, %66, %83 in 1 : vector<8x8xbf16>, vector<8x8xbf16>, vector<8x8xbf16>, vector<8x8xbf16> -> vector<8x32xbf16>
    %c0_32 = arith.constant 0 : index
    %c0_33 = arith.constant 0 : index
    %85 = vector.load %arg7[%c0_32, %c0_33] : memref<32x32xbf16, #tpu.memory_space<vmem>>, vector<32x32xbf16>
    %cst_34 = arith.constant dense<0.000000e+00> : vector<8x32xf32>
    %86 = tpu.matmul %84, %85, %cst_34 {dimension_numbers = #tpu.dot_dimension_numbers<[1], [0], [0], [1], [0, 0, 1, 1], [], []>} : vector<8x32xbf16>, vector<32x32xbf16>, vector<8x32xf32> -> vector<8x32xf32>
    %c0_35 = arith.constant 0 : index
    %c0_36 = arith.constant 0 : index
    %87 = vector.load %arg8[%c0_35, %c0_36] : memref<1x32xf32, #tpu.memory_space<vmem>>, vector<1x32xf32>
    %88 = vector.broadcast %87 : vector<1x32xf32> to vector<8x32xf32>
    %89 = arith.addf %86, %88 : vector<8x32xf32>
    %c0_37 = arith.constant 0 : index
    %c0_38 = arith.constant 0 : index
    %c0_39 = arith.constant 0 : index
    %90 = vector.load %arg9[%c0_37, %c0_38, %c0_39] : memref<1x8x32xf32, #tpu.memory_space<vmem>>, vector<1x8x32xf32>
    %91 = vector.shape_cast %90 : vector<1x8x32xf32> to vector<8x32xf32>
    %92 = vector.shape_cast %89 : vector<8x32xf32> to vector<1x8x32xf32>
    tpu.vector_store %arg9[%c0_37, %c0_38, %c0_39], %92 {strides = array<i32>} : memref<1x8x32xf32, #tpu.memory_space<vmem>>, vector<1x8x32xf32>,
    return
  }
  func.func @transform_0(%arg0: i32, %arg1: i32) -> (i32, i32, i32) {
    %c0_i32 = arith.constant 0 : i32
    %c0_i32_0 = arith.constant 0 : i32
    %c0_i32_1 = arith.constant 0 : i32
    return %arg0, %c0_i32, %c0_i32_0 : i32, i32, i32
  }
  func.func @transform_1(%arg0: i32, %arg1: i32) -> (i32, i32) {
    %c0_i32 = arith.constant 0 : i32
    %c0_i32_0 = arith.constant 0 : i32
    %c0_i32_1 = arith.constant 0 : i32
    return %c0_i32, %c0_i32_0 : i32, i32
  }
  func.func @transform_2(%arg0: i32, %arg1: i32) -> (i32, i32) {
    %c0_i32 = arith.constant 0 : i32
    %c0_i32_0 = arith.constant 0 : i32
    %c0_i32_1 = arith.constant 0 : i32
    return %c0_i32, %c0_i32_0 : i32, i32
  }
  func.func @transform_3(%arg0: i32, %arg1: i32) -> (i32, i32) {
    %c0_i32 = arith.constant 0 : i32
    %c0_i32_0 = arith.constant 0 : i32
    %c0_i32_1 = arith.constant 0 : i32
    return %c0_i32, %c0_i32_0 : i32, i32
  }
  func.func @transform_4(%arg0: i32, %arg1: i32) -> (i32, i32) {
    %c0_i32 = arith.constant 0 : i32
    %c0_i32_0 = arith.constant 0 : i32
    %c0_i32_1 = arith.constant 0 : i32
    return %c0_i32, %c0_i32_0 : i32, i32
  }
  func.func @transform_5(%arg0: i32, %arg1: i32) -> (i32, i32) {
    %c0_i32 = arith.constant 0 : i32
    %c0_i32_0 = arith.constant 0 : i32
    %c0_i32_1 = arith.constant 0 : i32
    return %c0_i32, %c0_i32_0 : i32, i32
  }
  func.func @transform_6(%arg0: i32, %arg1: i32) -> (i32, i32) {
    %c0_i32 = arith.constant 0 : i32
    %c0_i32_0 = arith.constant 0 : i32
    %c0_i32_1 = arith.constant 0 : i32
    return %c0_i32, %c0_i32_0 : i32, i32
  }
  func.func @transform_7(%arg0: i32, %arg1: i32) -> (i32, i32, i32) {
    %c0_i32 = arith.constant 0 : i32
    %c0_i32_0 = arith.constant 0 : i32
    return %arg0, %arg1, %c0_i32 : i32, i32, i32
  }
}

module attributes {stable_mosaic.version = 11 : i64} {
  func.func @_intervention_attn_kernel(%arg0: i32, %arg1: i32, %arg2: memref<1x8x32xbf16, #tpu.memory_space<vmem>>, %arg3: memref<32x32xbf16, #tpu.memory_space<vmem>>, %arg4: memref<1x32xf32, #tpu.memory_space<vmem>>, %arg5: memref<32x64xbf16, #tpu.memory_space<vmem>>, %arg6: memref<1x64xf32, #tpu.memory_space<vmem>>, %arg7: memref<32x32xbf16, #tpu.memory_space<vmem>>, %arg8: memref<1x32xf32, #tpu.memory_space<vmem>>, %arg9: memref<1x8x32xf32, #tpu.memory_space<vmem>>, %arg10: memref<8x64xbf16, #tpu.memory_space<vmem>>) attributes {dimension_semantics = [#tpu.dimension_semantics<parallel>, #tpu.dimension_semantics<arbitrary>], iteration_bounds = array<i64: 2, 1>, scalar_prefetch = 0 : i64, scratch_operands = 1 : i64, tpu.core_type = #tpu.core_type<tc>, window_params = [{transform_indices = @transform_0, window_bounds = array<i64: 1, 8, 32>}, {pipeline_mode = #tpu.pipeline_mode<synchronous>, transform_indices = @transform_1, window_bounds = array<i64: 32, 32>}, {pipeline_mode = #tpu.pipeline_mode<synchronous>, transform_indices = @transform_2, window_bounds = array<i64: 1, 32>}, {pipeline_mode = #tpu.pipeline_mode<synchronous>, transform_indices = @transform_3, window_bounds = array<i64: 32, 64>}, {pipeline_mode = #tpu.pipeline_mode<synchronous>, transform_indices = @transform_4, window_bounds = array<i64: 1, 64>}, {pipeline_mode = #tpu.pipeline_mode<synchronous>, transform_indices = @transform_5, window_bounds = array<i64: 32, 32>}, {pipeline_mode = #tpu.pipeline_mode<synchronous>, transform_indices = @transform_6, window_bounds = array<i64: 1, 32>}, {transform_indices = @transform_7, window_bounds = array<i64: 1, 8, 32>}]} {
    %c0_i32 = arith.constant 0 : i32
    %0 = arith.cmpi eq, %arg1, %c0_i32 : i32
    %1 = arith.extui %0 : i1 to i32
    %c0_i32_0 = arith.constant 0 : i32
    %2 = arith.cmpi ne, %1, %c0_i32_0 : i32
    scf.if %2 {
      %c0_40 = arith.constant 0 : index
      %c0_41 = arith.constant 0 : index
      %c0_42 = arith.constant 0 : index
      %93 = vector.load %arg2[%c0_40, %c0_41, %c0_42] : memref<1x8x32xbf16, #tpu.memory_space<vmem>>, vector<1x8x32xbf16>
      %94 = vector.shape_cast %93 : vector<1x8x32xbf16> to vector<8x32xbf16>
      %c0_43 = arith.constant 0 : index
      %c0_44 = arith.constant 0 : index
      %95 = vector.load %arg5[%c0_43, %c0_44] : memref<32x64xbf16, #tpu.memory_space<vmem>>, vector<32x64xbf16>
      %cst_45 = arith.constant dense<0.000000e+00> : vector<8x64xf32>
      %96 = tpu.matmul %94, %95, %cst_45 {dimension_numbers = #tpu.dot_dimension_numbers<[1], [0], [0], [1], [0, 0, 1, 1], [], []>} : vector<8x32xbf16>, vector<32x64xbf16>, vector<8x64xf32> -> vector<8x64xf32>
      %c0_46 = arith.constant 0 : index
      %c0_47 = arith.constant 0 : index
      %97 = vector.load %arg6[%c0_46, %c0_47] : memref<1x64xf32, #tpu.memory_space<vmem>>, vector<1x64xf32>
      %98 = vector.broadcast %97 : vector<1x64xf32> to vector<8x64xf32>
      %99 = arith.addf %96, %98 : vector<8x64xf32>
      %100 = tpu.iota {dimensions = array<i32: 0>} : vector<8x1xi32>
      %101 = tpu.iota {dimensions = array<i32: 1>} : vector<1x64xi32>
      %c0_i32_48 = arith.constant 0 : i32
      %102 = vector.broadcast %c0_i32_48 : i32 to vector<8x1xi32>
      %103 = arith.cmpi eq, %100, %102 : vector<8x1xi32>
      %c32_i32 = arith.constant 32 : i32
      %104 = vector.broadcast %c32_i32 : i32 to vector<1x64xi32>
      %105 = arith.cmpi sge, %101, %104 : vector<1x64xi32>
      %106 = vector.broadcast %103 : vector<8x1xi1> to vector<8x64xi1>
      %107 = vector.broadcast %105 : vector<1x64xi1> to vector<8x64xi1>
      %108 = arith.andi %106, %107 : vector<8x64xi1>
      %cst_49 = arith.constant 5.000000e-01 : f32
      %cst_50 = arith.constant 1.000000e+00 : f32
      %109 = vector.broadcast %cst_49 : f32 to vector<8x64xf32>
      %110 = vector.broadcast %cst_50 : f32 to vector<8x64xf32>
      %111 = arith.select %108, %109, %110 : vector<8x64xi1>, vector<8x64xf32>
      %112 = arith.mulf %99, %111 : vector<8x64xf32>
      %113 = arith.truncf %112 : vector<8x64xf32> to vector<8x64xbf16>
      %c0_51 = arith.constant 0 : index
      %c0_52 = arith.constant 0 : index
      %114 = vector.load %arg10[%c0_51, %c0_52] : memref<8x64xbf16, #tpu.memory_space<vmem>>, vector<8x64xbf16>
      tpu.vector_store %arg10[%c0_51, %c0_52], %113 {strides = array<i32>} : memref<8x64xbf16, #tpu.memory_space<vmem>>, vector<8x64xbf16>,
    } else {
    }
    %c8_i32 = arith.constant 8 : i32
    %3 = arith.muli %arg1, %c8_i32 : i32
    %4 = tpu.assume_multiple %3, 8 : i32
    %c0 = arith.constant 0 : index
    %5 = arith.index_cast %4 : i32 to index
    %c0_1 = arith.constant 0 : index
    %6 = vector.load %arg2[%c0, %5, %c0_1] : memref<1x8x32xbf16, #tpu.memory_space<vmem>>, vector<1x8x32xbf16>
    %7 = vector.shape_cast %6 : vector<1x8x32xbf16> to vector<8x32xbf16>
    %c0_2 = arith.constant 0 : index
    %c0_3 = arith.constant 0 : index
    %8 = vector.load %arg3[%c0_2, %c0_3] : memref<32x32xbf16, #tpu.memory_space<vmem>>, vector<32x32xbf16>
    %cst = arith.constant dense<0.000000e+00> : vector<8x32xf32>
    %9 = tpu.matmul %7, %8, %cst {dimension_numbers = #tpu.dot_dimension_numbers<[1], [0], [0], [1], [0, 0, 1, 1], [], []>} : vector<8x32xbf16>, vector<32x32xbf16>, vector<8x32xf32> -> vector<8x32xf32>
    %c0_4 = arith.constant 0 : index
    %c0_5 = arith.constant 0 : index
    %10 = vector.load %arg4[%c0_4, %c0_5] : memref<1x32xf32, #tpu.memory_space<vmem>>, vector<1x32xf32>
    %11 = vector.broadcast %10 : vector<1x32xf32> to vector<8x32xf32>
    %12 = arith.addf %9, %11 : vector<8x32xf32>
    %cst_6 = arith.constant 0.353553385 : f32
    %13 = vector.broadcast %cst_6 : f32 to vector<8x32xf32>
    %14 = arith.mulf %12, %13 : vector<8x32xf32>
    %15 = arith.truncf %14 : vector<8x32xf32> to vector<8x32xbf16>
    %16 = vector.extract_strided_slice %15 {offsets = [0, 0], sizes = [8, 8], strides = [1, 1]} : vector<8x32xbf16> to vector<8x8xbf16>
    %c0_7 = arith.constant 0 : index
    %c0_8 = arith.constant 0 : index
    %17 = vector.load %arg10[%c0_7, %c0_8] : memref<8x64xbf16, #tpu.memory_space<vmem>>, vector<8x8xbf16>
    %c0_9 = arith.constant 0 : index
    %c32 = arith.constant 32 : index
    %18 = vector.load %arg10[%c0_9, %c32] : memref<8x64xbf16, #tpu.memory_space<vmem>>, vector<8x8xbf16>
    %cst_10 = arith.constant dense<0.000000e+00> : vector<8x8xf32>
    %19 = tpu.matmul %16, %17, %cst_10 {dimension_numbers = #tpu.dot_dimension_numbers<[1], [1], [0], [0], [0, 0, 1, 0], [], []>} : vector<8x8xbf16>, vector<8x8xbf16>, vector<8x8xf32> -> vector<8x8xf32>
    %cst_11 = arith.constant dense<0xFF800000> : vector<8xf32>
    %20 = vector.multi_reduction <maximumf>, %19, %cst_11 [1] : vector<8x8xf32> to vector<8xf32>
    %21 = vector.shape_cast %20 : vector<8xf32> to vector<8x1xf32>
    %22 = vector.broadcast %21 : vector<8x1xf32> to vector<8x8xf32>
    %23 = arith.subf %19, %22 : vector<8x8xf32>
    %24 = math.exp %23 : vector<8x8xf32>
    %cst_12 = arith.constant dense<0.000000e+00> : vector<8xf32>
    %25 = vector.multi_reduction <add>, %24, %cst_12 [1] : vector<8x8xf32> to vector<8xf32>
    %26 = vector.shape_cast %25 : vector<8xf32> to vector<8x1xf32>
    %27 = arith.truncf %24 : vector<8x8xf32> to vector<8x8xbf16>
    %cst_13 = arith.constant dense<0.000000e+00> : vector<8x8xf32>
    %28 = tpu.matmul %27, %18, %cst_13 {dimension_numbers = #tpu.dot_dimension_numbers<[1], [0], [0], [1], [0, 0, 1, 1], [], []>} : vector<8x8xbf16>, vector<8x8xbf16>, vector<8x8xf32> -> vector<8x8xf32>
    %29 = tpu.reciprocal %26 {approx = true} : vector<8x1xf32> -> vector<8x1xf32>
    %30 = vector.broadcast %29 : vector<8x1xf32> to vector<8x8xf32>
    %31 = arith.mulf %28, %30 : vector<8x8xf32>
    %32 = arith.truncf %31 : vector<8x8xf32> to vector<8x8xbf16>
    %33 = vector.extract_strided_slice %15 {offsets = [0, 8], sizes = [8, 8], strides = [1, 1]} : vector<8x32xbf16> to vector<8x8xbf16>
    %c0_14 = arith.constant 0 : index
    %c8 = arith.constant 8 : index
    %34 = vector.load %arg10[%c0_14, %c8] : memref<8x64xbf16, #tpu.memory_space<vmem>>, vector<8x8xbf16>
    %c0_15 = arith.constant 0 : index
    %c40 = arith.constant 40 : index
    %35 = vector.load %arg10[%c0_15, %c40] : memref<8x64xbf16, #tpu.memory_space<vmem>>, vector<8x8xbf16>
    %cst_16 = arith.constant dense<0.000000e+00> : vector<8x8xf32>
    %36 = tpu.matmul %33, %34, %cst_16 {dimension_numbers = #tpu.dot_dimension_numbers<[1], [1], [0], [0], [0, 0, 1, 0], [], []>} : vector<8x8xbf16>, vector<8x8xbf16>, vector<8x8xf32> -> vector<8x8xf32>
    %cst_17 = arith.constant dense<0xFF800000> : vector<8xf32>
    %37 = vector.multi_reduction <maximumf>, %36, %cst_17 [1] : vector<8x8xf32> to vector<8xf32>
    %38 = vector.shape_cast %37 : vector<8xf32> to vector<8x1xf32>
    %39 = vector.broadcast %38 : vector<8x1xf32> to vector<8x8xf32>
    %40 = arith.subf %36, %39 : vector<8x8xf32>
    %41 = math.exp %40 : vector<8x8xf32>
    %cst_18 = arith.constant dense<0.000000e+00> : vector<8xf32>
    %42 = vector.multi_reduction <add>, %41, %cst_18 [1] : vector<8x8xf32> to vector<8xf32>
    %43 = vector.shape_cast %42 : vector<8xf32> to vector<8x1xf32>
    %44 = arith.truncf %41 : vector<8x8xf32> to vector<8x8xbf16>
    %cst_19 = arith.constant dense<0.000000e+00> : vector<8x8xf32>
    %45 = tpu.matmul %44, %35, %cst_19 {dimension_numbers = #tpu.dot_dimension_numbers<[1], [0], [0], [1], [0, 0, 1, 1], [], []>} : vector<8x8xbf16>, vector<8x8xbf16>, vector<8x8xf32> -> vector<8x8xf32>
    %46 = tpu.reciprocal %43 {approx = true} : vector<8x1xf32> -> vector<8x1xf32>
    %47 = vector.broadcast %46 : vector<8x1xf32> to vector<8x8xf32>
    %48 = arith.mulf %45, %47 : vector<8x8xf32>
    %49 = arith.truncf %48 : vector<8x8xf32> to vector<8x8xbf16>
    %50 = vector.extract_strided_slice %15 {offsets = [0, 16], sizes = [8, 8], strides = [1, 1]} : vector<8x32xbf16> to vector<8x8xbf16>
    %c0_20 = arith.constant 0 : index
    %c16 = arith.constant 16 : index
    %51 = vector.load %arg10[%c0_20, %c16] : memref<8x64xbf16, #tpu.memory_space<vmem>>, vector<8x8xbf16>
    %c0_21 = arith.constant 0 : index
    %c48 = arith.constant 48 : index
    %52 = vector.load %arg10[%c0_21, %c48] : memref<8x64xbf16, #tpu.memory_space<vmem>>, vector<8x8xbf16>
    %cst_22 = arith.constant dense<0.000000e+00> : vector<8x8xf32>
    %53 = tpu.matmul %50, %51, %cst_22 {dimension_numbers = #tpu.dot_dimension_numbers<[1], [1], [0], [0], [0, 0, 1, 0], [], []>} : vector<8x8xbf16>, vector<8x8xbf16>, vector<8x8xf32> -> vector<8x8xf32>
    %cst_23 = arith.constant dense<0xFF800000> : vector<8xf32>
    %54 = vector.multi_reduction <maximumf>, %53, %cst_23 [1] : vector<8x8xf32> to vector<8xf32>
    %55 = vector.shape_cast %54 : vector<8xf32> to vector<8x1xf32>
    %56 = vector.broadcast %55 : vector<8x1xf32> to vector<8x8xf32>
    %57 = arith.subf %53, %56 : vector<8x8xf32>
    %58 = math.exp %57 : vector<8x8xf32>
    %cst_24 = arith.constant dense<0.000000e+00> : vector<8xf32>
    %59 = vector.multi_reduction <add>, %58, %cst_24 [1] : vector<8x8xf32> to vector<8xf32>
    %60 = vector.shape_cast %59 : vector<8xf32> to vector<8x1xf32>
    %61 = arith.truncf %58 : vector<8x8xf32> to vector<8x8xbf16>
    %cst_25 = arith.constant dense<0.000000e+00> : vector<8x8xf32>
    %62 = tpu.matmul %61, %52, %cst_25 {dimension_numbers = #tpu.dot_dimension_numbers<[1], [0], [0], [1], [0, 0, 1, 1], [], []>} : vector<8x8xbf16>, vector<8x8xbf16>, vector<8x8xf32> -> vector<8x8xf32>
    %63 = tpu.reciprocal %60 {approx = true} : vector<8x1xf32> -> vector<8x1xf32>
    %64 = vector.broadcast %63 : vector<8x1xf32> to vector<8x8xf32>
    %65 = arith.mulf %62, %64 : vector<8x8xf32>
    %66 = arith.truncf %65 : vector<8x8xf32> to vector<8x8xbf16>
    %67 = vector.extract_strided_slice %15 {offsets = [0, 24], sizes = [8, 8], strides = [1, 1]} : vector<8x32xbf16> to vector<8x8xbf16>
    %c0_26 = arith.constant 0 : index
    %c24 = arith.constant 24 : index
    %68 = vector.load %arg10[%c0_26, %c24] : memref<8x64xbf16, #tpu.memory_space<vmem>>, vector<8x8xbf16>
    %c0_27 = arith.constant 0 : index
    %c56 = arith.constant 56 : index
    %69 = vector.load %arg10[%c0_27, %c56] : memref<8x64xbf16, #tpu.memory_space<vmem>>, vector<8x8xbf16>
    %cst_28 = arith.constant dense<0.000000e+00> : vector<8x8xf32>
    %70 = tpu.matmul %67, %68, %cst_28 {dimension_numbers = #tpu.dot_dimension_numbers<[1], [1], [0], [0], [0, 0, 1, 0], [], []>} : vector<8x8xbf16>, vector<8x8xbf16>, vector<8x8xf32> -> vector<8x8xf32>
    %cst_29 = arith.constant dense<0xFF800000> : vector<8xf32>
    %71 = vector.multi_reduction <maximumf>, %70, %cst_29 [1] : vector<8x8xf32> to vector<8xf32>
    %72 = vector.shape_cast %71 : vector<8xf32> to vector<8x1xf32>
    %73 = vector.broadcast %72 : vector<8x1xf32> to vector<8x8xf32>
    %74 = arith.subf %70, %73 : vector<8x8xf32>
    %75 = math.exp %74 : vector<8x8xf32>
    %cst_30 = arith.constant dense<0.000000e+00> : vector<8xf32>
    %76 = vector.multi_reduction <add>, %75, %cst_30 [1] : vector<8x8xf32> to vector<8xf32>
    %77 = vector.shape_cast %76 : vector<8xf32> to vector<8x1xf32>
    %78 = arith.truncf %75 : vector<8x8xf32> to vector<8x8xbf16>
    %cst_31 = arith.constant dense<0.000000e+00> : vector<8x8xf32>
    %79 = tpu.matmul %78, %69, %cst_31 {dimension_numbers = #tpu.dot_dimension_numbers<[1], [0], [0], [1], [0, 0, 1, 1], [], []>} : vector<8x8xbf16>, vector<8x8xbf16>, vector<8x8xf32> -> vector<8x8xf32>
    %80 = tpu.reciprocal %77 {approx = true} : vector<8x1xf32> -> vector<8x1xf32>
    %81 = vector.broadcast %80 : vector<8x1xf32> to vector<8x8xf32>
    %82 = arith.mulf %79, %81 : vector<8x8xf32>
    %83 = arith.truncf %82 : vector<8x8xf32> to vector<8x8xbf16>
    %84 = tpu.concatenate %32, %49, %66, %83 in 1 : vector<8x8xbf16>, vector<8x8xbf16>, vector<8x8xbf16>, vector<8x8xbf16> -> vector<8x32xbf16>
    %c0_32 = arith.constant 0 : index
    %c0_33 = arith.constant 0 : index
    %85 = vector.load %arg7[%c0_32, %c0_33] : memref<32x32xbf16, #tpu.memory_space<vmem>>, vector<32x32xbf16>
    %cst_34 = arith.constant dense<0.000000e+00> : vector<8x32xf32>
    %86 = tpu.matmul %84, %85, %cst_34 {dimension_numbers = #tpu.dot_dimension_numbers<[1], [0], [0], [1], [0, 0, 1, 1], [], []>} : vector<8x32xbf16>, vector<32x32xbf16>, vector<8x32xf32> -> vector<8x32xf32>
    %c0_35 = arith.constant 0 : index
    %c0_36 = arith.constant 0 : index
    %87 = vector.load %arg8[%c0_35, %c0_36] : memref<1x32xf32, #tpu.memory_space<vmem>>, vector<1x32xf32>
    %88 = vector.broadcast %87 : vector<1x32xf32> to vector<8x32xf32>
    %89 = arith.addf %86, %88 : vector<8x32xf32>
    %c0_37 = arith.constant 0 : index
    %c0_38 = arith.constant 0 : index
    %c0_39 = arith.constant 0 : index
    %90 = vector.load %arg9[%c0_37, %c0_38, %c0_39] : memref<1x8x32xf32, #tpu.memory_space<vmem>>, vector<1x8x32xf32>
    %91 = vector.shape_cast %90 : vector<1x8x32xf32> to vector<8x32xf32>
    %92 = vector.shape_cast %89 : vector<8x32xf32> to vector<1x8x32xf32>
    tpu.vector_store %arg9[%c0_37, %c0_38, %c0_39], %92 {strides = array<i32>} : memref<1x8x32xf32, #tpu.memory_space<vmem>>, vector<1x8x32xf32>,
    return
  }
  func.func @transform_0(%arg0: i32, %arg1: i32) -> (i32, i32, i32) {
    %c0_i32 = arith.constant 0 : i32
    %c0_i32_0 = arith.constant 0 : i32
    %c0_i32_1 = arith.constant 0 : i32
    return %arg0, %c0_i32, %c0_i32_0 : i32, i32, i32
  }
  func.func @transform_1(%arg0: i32, %arg1: i32) -> (i32, i32) {
    %c0_i32 = arith.constant 0 : i32
    %c0_i32_0 = arith.constant 0 : i32
    %c0_i32_1 = arith.constant 0 : i32
    return %c0_i32, %c0_i32_0 : i32, i32
  }
  func.func @transform_2(%arg0: i32, %arg1: i32) -> (i32, i32) {
    %c0_i32 = arith.constant 0 : i32
    %c0_i32_0 = arith.constant 0 : i32
    %c0_i32_1 = arith.constant 0 : i32
    return %c0_i32, %c0_i32_0 : i32, i32
  }
  func.func @transform_3(%arg0: i32, %arg1: i32) -> (i32, i32) {
    %c0_i32 = arith.constant 0 : i32
    %c0_i32_0 = arith.constant 0 : i32
    %c0_i32_1 = arith.constant 0 : i32
    return %c0_i32, %c0_i32_0 : i32, i32
  }
  func.func @transform_4(%arg0: i32, %arg1: i32) -> (i32, i32) {
    %c0_i32 = arith.constant 0 : i32
    %c0_i32_0 = arith.constant 0 : i32
    %c0_i32_1 = arith.constant 0 : i32
    return %c0_i32, %c0_i32_0 : i32, i32
  }
  func.func @transform_5(%arg0: i32, %arg1: i32) -> (i32, i32) {
    %c0_i32 = arith.constant 0 : i32
    %c0_i32_0 = arith.constant 0 : i32
    %c0_i32_1 = arith.constant 0 : i32
    return %c0_i32, %c0_i32_0 : i32, i32
  }
  func.func @transform_6(%arg0: i32, %arg1: i32) -> (i32, i32) {
    %c0_i32 = arith.constant 0 : i32
    %c0_i32_0 = arith.constant 0 : i32
    %c0_i32_1 = arith.constant 0 : i32
    return %c0_i32, %c0_i32_0 : i32, i32
  }
  func.func @transform_7(%arg0: i32, %arg1: i32) -> (i32, i32, i32) {
    %c0_i32 = arith.constant 0 : i32
    %c0_i32_0 = arith.constant 0 : i32
    return %arg0, %arg1, %c0_i32 : i32, i32, i32
  }
}

</mosaic_0001>

<bundles_post_ra>
// kernel: tpu_custom_call.1
= control target key start
LH: loop header
LB: loop body
LE: loop exit
PB: predicated region body
PF: predicated region fallthrough
CT: control target
= control target key end

     0   :  { %12 = vsyncpa [#allocation4], 0  ;;  %s1976_s0 = inlined_call_operand.hbm [shape: bf16[2,8,32], index: 0, kind: input, shape index: {}]   ;;  %s1977_s1 = inlined_call_operand.hbm [shape: bf16[32,32], index: 1, kind: input, shape index: {}]   ;;  %s1978_s2 = inlined_call_operand.vmem [shape: f32[1,32], index: 2, kind: input, shape index: {}]   ;;  %s1979_s3 = inlined_call_operand.hbm [shape: bf16[32,64], index: 3, kind: input, shape index: {}]   ;;  %s1980_s4 = inlined_call_operand.vmem [shape: f32[1,64], index: 4, kind: input, shape index: {}]   ;;  %s1981_s5 = inlined_call_operand.vmem [shape: bf16[32,32], index: 5, kind: input, shape index: {}]   ;;  %s1982_s6 = inlined_call_operand.vmem [shape: f32[1,32], index: 6, kind: input, shape index: {}]   ;;  %s1983_s7 = inlined_call_operand.hbm [shape: f32[2,8,32], index: 7, kind: output, shape index: {}]  }
   0x1   :  { %14 = vsyncpa [#allocation4 + $0x1], 0 }
   0x2   :  { %15 = vsyncpa [#allocation7], 0 }
   0x3   :  { %16 = vsyncpa [#allocation5], 0 }
   0x4   :  { %18 = vsyncpa [#allocation5 + $0x1], 0  ;;  %s1636_s24 = smov 0   ;;  %s1638_s25 = smov 0  }
   0x5   :  { %s1640_s26 = smov 0   ;;  %s1642_s27 = smov 0  }
   0x6   :  { %s1644_s28 = smov 0   ;;  %s1646_s29 = smov 0  }
   0x7 LB: > { %1990 = sst [smem:[#allocation13_spill]] %s1555_s24  ;;  %s1147_s30 = sadd.s32 4294967295, %s1575_s29   ;;  %s1575_s29 = sphi %s1646_s29, %s24_s29   ;;  %s1571_s28 = sphi %s1644_s28, %s2011_s28   ;;  %s1567_s27 = sphi %s1642_s27, %s2010_s27   ;;  %s1563_s26 = sphi %s1640_s26, %s2009_s26   ;;  %s1559_s25 = sphi %s1638_s25, %s2008_s25   ;;  %s1555_s24 = sphi %s1636_s24, %s2007_s24  }
   0x8   : > { %s1148_s8 = sadd.s32 4294967294, %s1575_s29   ;;  %p56_p0 = scmp.ne.s32.totalorder %s1559_s25, %s1555_s24 }
   0x9   : > { %p1670_p1 = scmp.eq.s32.totalorder %s1147_s30, 0  ;;  %p1674_p2 = scmp.eq.s32.totalorder %s1147_s30, 1 }
   0xa   : > { %p214_p3 = scmp.eq.s32.totalorder %s1148_s8, 1  ;;  %p1149_p5 = scmp.ge.s32.totalorder %s1575_s29, 1 }
   0xb   : > { %s1991_s9 = scalar_select %p1670_p1, 1, 0 }
   0xc   : > { %p1680_p4 = por %p1670_p1, %p56_p0  ;;  %p1685_p6 = por %p214_p3, %p56_p0 }
   0xd   : > { %p221_p7 = scmp.lt.s32.totalorder %s1575_s29, 3  ;;  %s1577_s14 = smov [#allocation6]  }
   0xe   : > { %s1993_s11 = scalar_select %p1680_p4, 1, 0 }
   0xf   : > { %s1994_s12 = scalar_select %p1685_p6, 1, 0 }
  0x10   : > { %p1690_p8 = pnand %p1149_p5, %p221_p7  ;;  %s233_s15 = sshll.u32 %s1577_s14, 4  ;;  %s1694_s15 = int_to_ptr.vmem [resolvable:$true] %s233_s15 }
  0x11   : > { %1995 = sst [smem:[#allocation14_spill]] %s1994_s12  ;;  %s1578_s17 = smov [#allocation8]  }
  0x12   : > { %p1294_p9 = pneg %p1690_p8  ;;  %s249_s18 = sshll.u32 %s1578_s17, 4  ;;  %s1705_s18 = int_to_ptr.vmem [resolvable:$true] %s249_s18 }
  0x13   : > { %s1403_s21 = scalar_lea.hbm %s1977_s1, 256 }
  0x14   : > { %p1701_p11 = pnand %p1294_p9, %p1670_p1  ;;  %p1404_p12 = scmp.ne.s32.totalorder %s1977_s1, %s1403_s21 }
  0x15   : > { %p1410_p5 = scmp.lt.u32.totalorder %s1403_s21, %s1977_s1 }
  0x16   : > { %p1405_p13 = pneg %p1701_p11 }
  0x18   : > { %p1406_p0 = pnand %p1405_p13, %p1404_p12 }
  0x1a   : > { %p1407_p3 = pneg %p1406_p0 }
  0x1c   : > { %p1412_p7 = pnand %p1410_p5, %p1407_p3 }
  0x1e   : > { %1415 = shalt.err (!%p1412_p7)
}
  0x1f   : > { %s1416_s14 = scalar_lea.vmem %s1694_s15, 256  ;;  %p1424_p1 = scmp.lt.s32.totalorder %s1694_s15, %s1694_s15 }
  0x20   : > { %p1417_p9 = scmp.ne.s32.totalorder %s1694_s15, %s1416_s14  ;;  %p1425_p12 = scmp.lt.s32.totalorder %s1416_s14, %s1416_s14 }
  0x22   : > { %p1419_p10 = pnand %p1417_p9, %p1405_p13  ;;  %p1426_p0 = por %p1425_p12, %p1424_p1 }
  0x24   : > { %p1420_p6 = pneg %p1419_p10 }
  0x26   : > { %p1427_p4 = pnand %p1426_p0, %p1420_p6 }
  0x28   : > { %1430 = shalt.err (!%p1427_p4)
}
  0x29   : > { %s1579_s17 = smov 64   ;;  %s1580_s19 = smov 4  }
  0x2a   : > { %1297 = dma.hbm_to_vmem [thread:$0]  (!%p1701_p11), %s1977_s1, 256, %s1694_s15, [#allocation7], %s1579_s17, %s1579_s17, %s1580_s19  }
  0x2b   : > { %s1431_s30 = scalar_lea.hbm %s1979_s3, 256 }
  0x2c   : > { %p1432_p1 = scmp.ne.s32.totalorder %s1979_s3, %s1431_s30  ;;  %p1438_p10 = scmp.lt.u32.totalorder %s1431_s30, %s1979_s3 }
  0x2e   : > { %p1434_p4 = pnand %p1432_p1, %p1405_p13 }
  0x30   : > { %p1435_p6 = pneg %p1434_p4 }
  0x32   : > { %p1440_p3 = pnand %p1438_p10, %p1435_p6 }
  0x34   : > { %1443 = shalt.err (!%p1440_p3)
}
  0x35   : > { %s1444_s15 = scalar_lea.vmem %s1705_s18, 256  ;;  %p1452_p12 = scmp.lt.s32.totalorder %s1705_s18, %s1705_s18 }
  0x36   : > { %p1445_p5 = scmp.ne.s32.totalorder %s1705_s18, %s1444_s15  ;;  %p1453_p0 = scmp.lt.s32.totalorder %s1444_s15, %s1444_s15 }
  0x38   : > { %p1447_p7 = pnand %p1445_p5, %p1405_p13  ;;  %p1454_p1 = por %p1453_p0, %p1452_p12 }
  0x3a   : > { %p1448_p9 = pneg %p1447_p7 }
  0x3c   : > { %p1455_p4 = pnand %p1454_p1, %p1448_p9 }
  0x3e   : > { %1458 = shalt.err (!%p1455_p4)
}
  0x3f   : > { %1300 = dma.hbm_to_vmem [thread:$0]  (!%p1701_p11), %s1979_s3, 256, %s1705_s18, [#allocation7], %s1579_s17, %s1579_s17, %s1580_s19  }
  0x40   : > { %s36_s20 = sadd.s32 1, %s1571_s28  ;;  %s43_s21 = sadd.s32 1, %s1563_s26 }
  0x41   : > { %p38_p13 = scmp.ge.s32.totalorder %s36_s20, 2  ;;  %p50_p6 = scmp.ne.s32.totalorder %s1563_s26, %s1559_s25 }
  0x42   : > { %p51_p10 = scmp.eq.s32.totalorder %s1575_s29, 0  ;;  %p1311_p3 = scmp.lt.s32.totalorder %s1575_s29, 2 }
  0x43   : > { %s2013_s20 = smov (%p38_p13, %s36_s20), 0  ;;  %p1769_p7 = por %p1674_p2, %p50_p6 }
  0x44   : > { %p52_p5 = por %p51_p10, %p50_p6  ;;  %s40_s22 = ssub.s32 %s1571_s28, %s2013_s20 }
  0x45   : > { %s1998_s16 = scalar_select %p1769_p7, 1, 0 }
  0x46   : > { %s272_s23 = sand.u32 1, %s1563_s26   ;;  %p41_p9 = scmp.eq.s32.totalorder %s40_s22, 0 }
  0x47   : > { %s1153_s18 = sshll.u32 %s272_s23, 2  ;;  %s1154_s17 = sshll.u32 %s1571_s28, 6 }
  0x48   : > { %s1778_s19 = scalar_select %p41_p9, %s1563_s26, %s43_s21  }
  0x49   : > { %s1783_s14 = scalar_lea.hbm %s1976_s0, %s1154_s17  ;;  %s276_s10 = scalar_lea.vmem [#allocation3], %s1153_s18 }
  0x4a   : > { %s283_s15 = sshll.u32 %s276_s10, 4  ;;  %p1787_p2 = pnand %p1311_p3, %p52_p5  ;;  %s1791_s15 = int_to_ptr.vmem [resolvable:$true] %s283_s15 }
  0x4b   : > { %s273_s12 = scalar_lea.sflag [#allocation4], %s272_s23  ;;  %s1459_s21 = scalar_lea.hbm %s1783_s14, 64 }
  0x4c   : > { %p1460_p11 = scmp.ne.s32.totalorder %s1783_s14, %s1459_s21  ;;  %p1461_p12 = pneg %p1787_p2 }
  0x4d   : > { %s1464_s17 = scalar_lea.hbm %s1976_s0, 128  ;;  %p1465_p4 = scmp.lt.u32.totalorder %s1783_s14, %s1976_s0 }
  0x4e   : > { %p1462_p0 = pnand %p1461_p12, %p1460_p11  ;;  %p1466_p13 = scmp.lt.u32.totalorder %s1464_s17, %s1459_s21 }
  0x4f   : > { %p1468_p10 = scmp.lt.u32.totalorder %s1459_s21, %s1783_s14 }
  0x50   : > { %p1463_p1 = pneg %p1462_p0  ;;  %p1467_p6 = por %p1466_p13, %p1465_p4 }
  0x52   : > { %p1469_p3 = por %p1468_p10, %p1467_p6 }
  0x54   : > { %p1470_p5 = pnand %p1469_p3, %p1463_p1 }
  0x56   : > { %1473 = shalt.err (!%p1470_p5)
}
  0x57   : > { %s1474_s23 = scalar_lea.vmem %s1791_s15, 64  ;;  %s1581_s10 = smov [#allocation3]  }
  0x58   : > { %p1475_p9 = scmp.ne.s32.totalorder %s1791_s15, %s1474_s23  ;;  %s1479_s22 = sshll.u32 %s1581_s10, 4  ;;  %s1480_s22 = int_to_ptr.vmem [resolvable:$false] %s1479_s22 }
  0x59   : > { %s1481_s18 = scalar_lea.vmem %s1480_s22, 128  ;;  %p1482_p7 = scmp.lt.s32.totalorder %s1791_s15, %s1480_s22 }
  0x5a   : > { %p1477_p11 = pnand %p1475_p9, %p1461_p12  ;;  %p1483_p4 = scmp.lt.s32.totalorder %s1481_s18, %s1474_s23 }
  0x5c   : > { %p1478_p0 = pneg %p1477_p11  ;;  %p1484_p13 = por %p1483_p4, %p1482_p7 }
  0x5e   : > { %p1485_p6 = pnand %p1484_p13, %p1478_p0 }
  0x60   : > { %1488 = shalt.err (!%p1485_p6)
}
  0x61   : > { %1304 = dma.hbm_to_vmem [thread:$0]  (!%p1787_p2), %s1783_s14, 64, %s1791_s15, %s273_s12  }
  0x62   : > { %292 = sbr.rel (%p1690_p8) target bundleno = 1425 (0x591), region = 48  ;;  %s1821_s21 = sand.u32 (!%p1690_p8), 1, %s1559_s25  }
  0x63   : > { %s1156_s17 = sshll.u32 (!%p1690_p8), %s1821_s21, 2  ;;  %s295_s30 = scalar_lea.sflag (!%p1690_p8), [#allocation4], %s1821_s21 }
  0x64   : > { %s298_s8 = scalar_lea.vmem (!%p1690_p8), [#allocation3], %s1156_s17  ;;  %p2000_p7 = scmp.ne.s32.totalorder (!%p1690_p8), %s1993_s11, 0 }
  0x69   : > { %1542 = dma.done.wait (%p2000_p7), %s295_s30, 64  }
  0x6a   : > { %1544 = vsyncadd (%p2000_p7), %s295_s30, 4294967232  ;;  %p2001_p12 = scmp.ne.s32.totalorder %s1991_s9, 0 }
  0x6c   : > { %1546 = dma.done.wait (%p2001_p12), [#allocation7], 512  }
  0x6d   : > { %1548 = vsyncadd (%p2001_p12), [#allocation7], 4294966784  ;;  %v1582_v0 = vmov 0.0   ;;  %vm1583_vm0 = vmmov 0   ;;  %v1380_v1 = vld [vmem:[#allocation8] sm:$0xff]   ;;  %v1381_v2 = vld [vmem:[#allocation8 + $0x8] sm:$0xff]   ;;  %v410_v7 = vlaneseq }
  0x6e   : > { %1210 = vmatprep.subr.bf16.mxu0 %v1582_v0  ;;  %1214 = vmatprep.mubr.msk.bf16.mxu0 %vm1583_vm0, %v1582_v0  ;;  %v1382_v3 = vld [vmem:[#allocation6] sm:$0xff]   ;;  %v1383_v4 = vld [vmem:[#allocation6 + $0x8] sm:$0xff]   ;;  %v342_v5 = vld [vmem:[%s298_s8] sm:$0xf]  ;;  %vm366_vm1 = vcmask 261120   ;;  %v1584_v12 = vmov 1.0  }
  0x6f   : > { %1218 = vmatprep.subr.bf16.mxu1 %v1582_v0  ;;  %1222 = vmatprep.mubr.msk.bf16.mxu1 %vm1583_vm0, %v1582_v0  ;;  %v431_v6 = vld [vmem:[%s298_s8] sm:$0xf]  ;;  %v411_v8 = vshrl.u32 %v410_v7, 7  ;;  %v413_v9 = vand.u32 127, %v410_v7  ;;  %v1160_v10 = vld [vmem:[%s1980_s4] ss:$0 sm:$0xff] }
  0x70   : > { %1211 = vmatpush3.bf16.msra.mxu0 %v1380_v1  ;;  %1219 = vmatpush3.bf16.msra.mxu1 %v1382_v3  ;;  %vm424_vm5 = vcmask 519168   ;;  %v1164_v23 = vld [vmem:[%s1978_s2] ss:$0 sm:$0xff]  ;;  %vm502_vm6 = vcmask 64512   ;;  %s1585_s15 = smov 112   ;;  %s1586_s24 = smov 120  }
  0x71   : > { %1212 = vmatprep.subr.bf16.mxu0 %v1582_v0  ;;  %1220 = vmatprep.subr.bf16.mxu1 %v1582_v0  ;;  %vm414_vm2 = vcmp.eq.s32.totalorder %v411_v8, 0  ;;  %vm415_vm3 = vcmp.ge.s32.totalorder %v413_v9, 32  ;;  %s1587_s12 = smov 104   ;;  %s1588_s23 = smov 96   ;;  %vm567_vm7 = vcmask 1043456   ;;  %vm960_vm8 = vcmask 130048  }
  0x72   : > { %vm420_vm4 = vmand %vm414_vm2, %vm415_vm3  ;;  %s1589_s10 = smov 80   ;;  %s1590_s22 = smov 72   ;;  %vm963_vm9 = vcmask 195584  }
  0x73   : > { %v421_v13 = vsel %vm420_vm4, 0.5, %v1584_v12  ;;  %s1591_s18 = smov 88   ;;  %s1592_s11 = smov 8  }
  0x74   : > { %1213 = vmatpush3.bf16.msra.mxu0 %v1381_v2  ;;  %1221 = vmatpush3.bf16.msra.mxu1 %v1383_v4  ;;  %s1593_s13 = smov 16   ;;  %s1594_s14 = smov 24  }
  0x75   : > { %1226 = vmatprep.subr.bf16.mxu0 %v1582_v0  ;;  %1232 = vmatprep.subr.bf16.mxu1 %v1582_v0  ;;  %p2002_p2 = scmp.ne.s32.totalorder %s1998_s16, 0  ;;  %s1595_s9 = smov [#allocation9]  }
  0x77   : > { %1215 = vmatmul.mubr.msk.bf16.vlgmr.msra.gmra.mrb[0].mxu0 %vm366_vm1, %v342_v5  ;;  %1223 = vmatmul.mubr.msk.bf16.vlgmr.msra.gmra.mrb[0].mxu1 %vm366_vm1, %v431_v6 }
  0x78   : > { %1228 = vmatprep.mubr.msk.bf16.mxu0 %vm1583_vm0, %v1582_v0  ;;  %1234 = vmatprep.mubr.msk.bf16.mxu1 %vm1583_vm0, %v1582_v0 }
 0x14a   : > { %v404_v11 = vpop.f32.mrb[0].mxu0  ;;  %v493_v19 = vpop.f32.mrb[0].mxu1 }
 0x14b   : > { %v405_v14 = vadd.f32 %v1160_v10, %v404_v11  ;;  %v1216_v15 = vpop.f32.mrb[1].mxu0  ;;  %v1224_v20 = vpop.f32.mrb[1].mxu1  ;;  %v494_v25 = vadd.f32 %v1164_v23, %v493_v19 }
 0x14c   : > { %v407_v16 = vpop.f32.mrb[2].mxu0  ;;  %v496_v22 = vpop.f32.mrb[2].mxu1 }
 0x14d   : > { %v422_v17 = vmul.f32 %v421_v13, %v405_v14  ;;  %v1217_v18 = vpop.f32.mrb[3].mxu0  ;;  %v1225_v24 = vpop.f32.mrb[3].mxu1  ;;  %v499_v26 = vmul.f32 0.35355338, %v494_v25 }
 0x14f   : > { %v423_v21 = vpack.c.bf16 %v422_v17, %v422_v17  ;;  %v500_v30 = vpack.c.bf16 %v499_v26, %v499_v26 }
 0x151   : > { %425 = vst.msk [vmem:[#allocation2] sm:$0xf] %vm424_vm5, %v423_v21 }
 0x158   : > { %v501_v27 = vld [vmem:[#allocation2] sm:$0xf] }
 0x159   : > { %v507_v28 = vsel %vm502_vm6, %v501_v27, 0  ;;  %v1856_v29 = vcombine.low %v501_v27, %v501_v27 }
 0x15a   : > { %1227 = vmatpush3.bf16.xpose.msra.mxu0 %v507_v28 }
 0x15b   : > { %728 = vrot.lane.b32.xlu1 %v1856_v29, %s1585_s15  ;;  %617 = vrot.lane.b32.xlu0 %v1856_v29, %s1586_s24 }
 0x15c   : > { %1238 = vmatprep.subr.bf16.mxu0 %v1582_v0 }
 0x15f   : > { %726 = vrot.lane.b32.xlu1 %v500_v30, %s1585_s15  ;;  %615 = vrot.lane.b32.xlu0 %v500_v30, %s1586_s24  ;;  %s1159_s15 = sshll.u32 %s1821_s21, 3 }
 0x161   : > { %1229 = vmatmul.mubr.msk.bf16.vlgmr.msra.gmra.mrb[4].mxu0 %vm502_vm6, %v500_v30 }
 0x162   : > { %1240 = vmatprep.mubr.msk.bf16.mxu0 %vm1583_vm0, %v1582_v0 }
 0x163   : > { %837 = vrot.lane.b32.xlu1 %v500_v30, %s1587_s12  ;;  %839 = vrot.lane.b32.xlu0 %v1856_v29, %s1587_s12 }
 0x167   : > { %562 = vrot.lane.b32.xlu1 %v1856_v29, %s1588_s23  ;;  %s1182_s23 = sshll.u32 %s1567_s27, 7  ;;  %s1033_s27 = scalar_lea.sflag [#allocation5], %s1821_s21 }
 0x168   : > { %s1926_s30 = scalar_lea.hbm %s1983_s7, %s1182_s23 }
 0x1cd   : > { %v729_v31 = vpop.permute.xlu1 %728  ;;  %v618_v32 = vpop.permute.xlu0 %617 }
 0x1ce   : > { %v623_v33 = vsel %vm502_vm6, %v618_v32, 0  ;;  %v734_v37 = vsel %vm502_vm6, %v729_v31, 0 }
 0x1cf   : > { %1239 = vmatpush3.bf16.xpose.msra.mxu0 %v623_v33 }
 0x1d0   : > { %1250 = vmatprep.subr.bf16.mxu0 %v1582_v0 }
 0x1d1   : > { %v727_v34 = vpop.permute.xlu1 %726  ;;  %v616_v35 = vpop.permute.xlu0 %615 }
 0x1d5   : > { %v838_v36 = vpop.permute.xlu1 %837  ;;  %v840_v40 = vpop.permute.xlu0 %839 }
 0x1d6   : > { %1241 = vmatmul.mubr.msk.bf16.vlgmr.msra.gmra.mrb[8].mxu0 %vm502_vm6, %v616_v35  ;;  %v845_v41 = vsel %vm502_vm6, %v840_v40, 0 }
 0x1d7   : > { %1251 = vmatpush3.bf16.xpose.msra.mxu0 %v734_v37  ;;  %1252 = vmatprep.mubr.msk.bf16.mxu0 %vm1583_vm0, %v1582_v0  ;;  %v1385_v37 = vld [vmem:[%s1981_s5] sm:$0xff]  }
 0x1d8   : > { %1262 = vmatprep.subr.bf16.mxu0 %v1582_v0 }
 0x1d9   : > { %v563_v38 = vpop.permute.xlu1 %562 }
 0x1da   : > { %v569_v39 = vsel %vm567_vm7, %v563_v38, 0 }
 0x1db   : > { %1233 = vmatpush3.bf16.msra.mxu1 %v569_v39 }
 0x1dc   : > { %1244 = vmatprep.subr.bf16.mxu1 %v1582_v0 }
 0x1de   : > { %1253 = vmatmul.mubr.msk.bf16.vlgmr.msra.gmra.mrb[12].mxu0 %vm502_vm6, %v727_v34 }
 0x1df   : > { %1263 = vmatpush3.bf16.xpose.msra.mxu0 %v845_v41  ;;  %1264 = vmatprep.mubr.msk.bf16.mxu0 %vm1583_vm0, %v1582_v0  ;;  %v1386_v41 = vld [vmem:[%s1981_s5 + $0x8] sm:$0xff]  }
 0x1e0   : > { %1274 = vmatprep.subr.bf16.mxu0 %v1582_v0 }
 0x1e6   : > { %1265 = vmatmul.mubr.msk.bf16.vlgmr.msra.gmra.mrb[16].mxu0 %vm502_vm6, %v838_v36 }
 0x1e7   : > { %1278 = vmatprep.mubr.msk.bf16.mxu0 %vm1583_vm0, %v1582_v0  ;;  %1275 = vmatpush3.bf16.msra.mxu0 %v1385_v37 }
 0x1e8   : > { %1276 = vmatprep.subr.bf16.mxu0 %v1582_v0 }
 0x1eb   : > { %1277 = vmatpush3.bf16.msra.mxu0 %v1386_v41 }
 0x234   : > { %v543_v42 = vpop.f32.mrb[4].mxu0 }
 0x235   : > { %v1230_v43 = vpop.f32.mrb[5].mxu0  ;;  %v549_v44 = vsel %vm502_vm6, %v543_v42, -inf }
 0x236   : > { %550 = vmax.xlane.f32.xlu0 %v549_v44  ;;  %v546_v45 = vpop.f32.mrb[6].mxu0 }
 0x237   : > { %v1231_v46 = vpop.f32.mrb[7].mxu0 }
 0x2a9   : > { %v659_v47 = vpop.f32.mrb[8].mxu0 }
 0x2aa   : > { %v1242_v48 = vpop.f32.mrb[9].mxu0  ;;  %v665_v49 = vsel %vm502_vm6, %v659_v47, -inf }
 0x2ab   : > { %666 = vmax.xlane.f32.xlu1 %v665_v49  ;;  %v662_v50 = vpop.f32.mrb[10].mxu0 }
 0x2ac   : > { %v1243_v51 = vpop.f32.mrb[11].mxu0 }
 0x2b1   : > { %v770_v52 = vpop.f32.mrb[12].mxu0 }
 0x2b2   : > { %v1254_v53 = vpop.f32.mrb[13].mxu0  ;;  %v776_v54 = vsel %vm502_vm6, %v770_v52, -inf }
 0x2b3   : > { %777 = vmax.xlane.f32.xlu0 %v776_v54  ;;  %v773_v55 = vpop.f32.mrb[14].mxu0 }
 0x2b4   : > { %v1255_v56 = vpop.f32.mrb[15].mxu0 }
 0x2b9   : > { %v881_v57 = vpop.f32.mrb[16].mxu0 }
 0x2ba   : > { %v1266_v58 = vpop.f32.mrb[17].mxu0  ;;  %v887_v59 = vsel %vm502_vm6, %v881_v57, -inf }
 0x2bb   : > { %888 = vmax.xlane.f32.xlu0 %v887_v59  ;;  %v884_v60 = vpop.f32.mrb[18].mxu0 }
 0x2bc   : > { %786 = vrot.lane.b32.xlu1 %v1856_v29, %s1589_s10  ;;  %v1267_v61 = vpop.f32.mrb[19].mxu0  ;;  %s336_s10 = scalar_lea.vmem [#allocation9], %s1159_s15 }
 0x2c0   : > { %897 = vrot.lane.b32.xlu1 %v1856_v29, %s1590_s22  ;;  %s1047_s22 = sshll.u32 %s336_s10, 4  ;;  %s1928_s22 = int_to_ptr.vmem [resolvable:$true] %s1047_s22 }
 0x2c1   : > { %s1489_s8 = scalar_lea.vmem %s1928_s22, 128 }
 0x2c2   : > { %p1490_p8 = scmp.ne.s32.totalorder %s1928_s22, %s1489_s8 }
 0x2c3   : > { %v551_v62 = vpop.xlane.xlu0 %550 }
 0x2c4   : > { %v552_v63 = vsub.f32 %v543_v42, %v551_v62  ;;  %p1491_p1 = pnand %p1490_p8, %p2002_p2 }
 0x2c6   : > { %v553_v1 = vmul.f32 1.442695, %v552_v63  ;;  %p1492_p10 = pneg %p1491_p1 }
 0x2c8   : > { %1387 = vpow2.f32 %v553_v1 }
 0x2d1   : > { %675 = vrot.lane.b32.xlu0 %v1856_v29, %s1591_s18 }
 0x2d2   : > { %v1388_v2 = vpop.eup %1387 }
 0x2d3   : > { %v558_v3 = vpack.c.bf16 %v1388_v2, %v1388_v2  ;;  %v555_v27 = vsel %vm502_vm6, %v1388_v2, 0.0 }
 0x2d5   : > { %1235 = vmatmul.mubr.msk.bf16.vlgmr.msra.gmra.mrb[4].mxu1 %vm502_vm6, %v558_v3 }
 0x2d6   : > { %1246 = vmatprep.mubr.msk.bf16.mxu1 %vm1583_vm0, %v1582_v0 }
 0x338   : > { %v667_v4 = vpop.xlane.xlu1 %666 }
 0x339   : > { %v668_v5 = vsub.f32 %v659_v47, %v667_v4 }
 0x33b   : > { %v669_v6 = vmul.f32 1.442695, %v668_v5  ;;  %v1177_v5 = vld [vmem:[%s1982_s6] ss:$0 sm:$0xff] }
 0x33c   : > { %v787_v17 = vpop.permute.xlu1 %786 }
 0x33d   : > { %1389 = vpow2.f32 %v669_v6  ;;  %v792_v21 = vsel %vm567_vm7, %v787_v17, 0 }
 0x340   : > { %v778_v7 = vpop.xlane.xlu0 %777  ;;  %v898_v22 = vpop.permute.xlu1 %897 }
 0x341   : > { %v779_v8 = vsub.f32 %v770_v52, %v778_v7  ;;  %v903_v26 = vsel %vm567_vm7, %v898_v22, 0 }
 0x343   : > { %v780_v9 = vmul.f32 1.442695, %v779_v8 }
 0x345   : > { %1391 = vpow2.f32 %v780_v9 }
 0x347   : > { %v1390_v10 = vpop.eup %1389 }
 0x348   : > { %v889_v11 = vpop.xlane.xlu0 %888  ;;  %v671_v12 = vsel %vm502_vm6, %v1390_v10, 0.0  ;;  %v674_v19 = vpack.c.bf16 %v1390_v10, %v1390_v10 }
 0x349   : > { %v890_v13 = vsub.f32 %v881_v57, %v889_v11  ;;  %672 = vadd.xlane.f32.xlu0 %v671_v12 }
 0x34b   : > { %v891_v14 = vmul.f32 1.442695, %v890_v13 }
 0x34c   : > { %v676_v15 = vpop.permute.xlu0 %675 }
 0x34d   : > { %1393 = vpow2.f32 %v891_v14  ;;  %v681_v16 = vsel %vm567_vm7, %v676_v15, 0 }
 0x34e   : > { %1245 = vmatpush3.bf16.msra.mxu1 %v681_v16 }
 0x34f   : > { %v1392_v18 = vpop.eup %1391  ;;  %1256 = vmatprep.subr.bf16.mxu1 %v1582_v0 }
 0x350   : > { %v782_v20 = vsel %vm502_vm6, %v1392_v18, 0.0  ;;  %v785_v24 = vpack.c.bf16 %v1392_v18, %v1392_v18 }
 0x351   : > { %783 = vadd.xlane.f32.xlu1 %v782_v20  ;;  %1247 = vmatmul.mubr.msk.bf16.vlgmr.msra.gmra.mrb[8].mxu1 %vm502_vm6, %v674_v19 }
 0x352   : > { %1257 = vmatpush3.bf16.msra.mxu1 %v792_v21  ;;  %1258 = vmatprep.mubr.msk.bf16.mxu1 %vm1583_vm0, %v1582_v0 }
 0x353   : > { %1268 = vmatprep.subr.bf16.mxu1 %v1582_v0 }
 0x357   : > { %v1394_v23 = vpop.eup %1393 }
 0x358   : > { %v893_v25 = vsel %vm502_vm6, %v1394_v23, 0.0  ;;  %v896_v28 = vpack.c.bf16 %v1394_v23, %v1394_v23 }
 0x359   : > { %894 = vadd.xlane.f32.xlu0 %v893_v25  ;;  %1259 = vmatmul.mubr.msk.bf16.vlgmr.msra.gmra.mrb[12].mxu1 %vm502_vm6, %v785_v24 }
 0x35a   : > { %1269 = vmatpush3.bf16.msra.mxu1 %v903_v26  ;;  %1270 = vmatprep.mubr.msk.bf16.mxu1 %vm1583_vm0, %v1582_v0 }
 0x35d   : > { %556 = vadd.xlane.f32.xlu0 %v555_v27 }
 0x361   : > { %1271 = vmatmul.mubr.msk.bf16.vlgmr.msra.gmra.mrb[16].mxu1 %vm502_vm6, %v896_v28 }
 0x3a8   : > { %v605_v29 = vpop.f32.mrb[4].mxu1 }
 0x3a9   : > { %v1236_v30 = vpop.f32.mrb[5].mxu1 }
 0x3aa   : > { %v608_v31 = vpop.f32.mrb[6].mxu1 }
 0x3ab   : > { %v1237_v32 = vpop.f32.mrb[7].mxu1 }
 0x3d6   : > { %v673_v33 = vpop.xlane.xlu0 %672 }
 0x3d7   : > { %1395 = vrcp.f32 %v673_v33 }
 0x3de   : > { %v784_v34 = vpop.xlane.xlu1 %783 }
 0x3df   : > { %1397 = vrcp.f32 %v784_v34 }
 0x3e1   : > { %v1396_v35 = vpop.eup %1395 }
 0x3e6   : > { %v895_v42 = vpop.xlane.xlu0 %894 }
 0x3e7   : > { %1399 = vrcp.f32 %v895_v42 }
 0x3e9   : > { %v1398_v45 = vpop.eup %1397 }
 0x3ea   : > { %v557_v58 = vpop.xlane.xlu0 %556 }
 0x3eb   : > { %1401 = vrcp.f32 %v557_v58 }
 0x3f1   : > { %v1400_v52 = vpop.eup %1399 }
 0x3f5   : > { %v1402_v59 = vpop.eup %1401 }
 0x3f6   : > { %v612_v60 = vmul.f32 %v1402_v59, %v605_v29 }
 0x3f8   : > { %v613_v62 = vpack.c.bf16 %v612_v60, %v612_v60 }
 0x424   : > { %v717_v36 = vpop.f32.mrb[8].mxu1 }
 0x425   : > { %v724_v38 = vmul.f32 %v1396_v35, %v717_v36  ;;  %v1248_v39 = vpop.f32.mrb[9].mxu1 }
 0x426   : > { %v720_v40 = vpop.f32.mrb[10].mxu1 }
 0x427   : > { %v725_v43 = vpack.c.bf16 %v724_v38, %v724_v38  ;;  %v1249_v44 = vpop.f32.mrb[11].mxu1 }
 0x429   : > { %949 = vrot.lane.b32.xlu1 %v725_v43, %s1592_s11  ;;  %s1493_s11 = sshll.u32 %s1595_s9, 4  ;;  %s1494_s11 = int_to_ptr.vmem [resolvable:$false] %s1493_s11 }
 0x42a   : > { %p1496_p3 = scmp.lt.s32.totalorder %s1928_s22, %s1494_s11 }
 0x42c   : > { %v828_v46 = vpop.f32.mrb[12].mxu1 }
 0x42d   : > { %v835_v47 = vmul.f32 %v1398_v45, %v828_v46  ;;  %v1260_v48 = vpop.f32.mrb[13].mxu1 }
 0x42e   : > { %v831_v49 = vpop.f32.mrb[14].mxu1 }
 0x42f   : > { %v836_v50 = vpack.c.bf16 %v835_v47, %v835_v47  ;;  %v1261_v51 = vpop.f32.mrb[15].mxu1 }
 0x431   : > { %952 = vrot.lane.b32.xlu0 %v836_v50, %s1593_s13  ;;  %s1495_s13 = scalar_lea.vmem %s1494_s11, 256 }
 0x432   : > { %p1497_p5 = scmp.lt.s32.totalorder %s1495_s13, %s1489_s8 }
 0x434   : > { %v939_v53 = vpop.f32.mrb[16].mxu1  ;;  %p1498_p9 = por %p1497_p5, %p1496_p3 }
 0x435   : > { %v946_v54 = vmul.f32 %v1400_v52, %v939_v53  ;;  %v1272_v55 = vpop.f32.mrb[17].mxu1 }
 0x436   : > { %v942_v56 = vpop.f32.mrb[18].mxu1  ;;  %p1499_p11 = pnand %p1498_p9, %p1492_p10 }
 0x437   : > { %v947_v57 = vpack.c.bf16 %v946_v54, %v946_v54  ;;  %v1273_v0 = vpop.f32.mrb[19].mxu1 }
 0x439   : > { %955 = vrot.lane.b32.xlu1 %v947_v57, %s1594_s14 }
 0x49b   : > { %v950_v61 = vpop.permute.xlu1 %949 }
 0x49c   : > { %v959_v1 = vsel %vm502_vm6, %v613_v62, %v950_v61 }
 0x4a3   : > { %v953_v63 = vpop.permute.xlu0 %952 }
 0x4a4   : > { %v962_v2 = vsel %vm960_vm8, %v959_v1, %v953_v63 }
 0x4ab   : > { %v956_v3 = vpop.permute.xlu1 %955 }
 0x4ac   : > { %v965_v4 = vsel %vm963_vm9, %v962_v2, %v956_v3 }
 0x4ad   : > { %1279 = vmatmul.mubr.msk.bf16.vlgmr.msra.gmra.mrb[20].mxu0 %vm366_vm1, %v965_v4 }
 0x580   : > { %v1025_v6 = vpop.f32.mrb[20].mxu0 }
 0x581   : > { %v1026_v7 = vadd.f32 %v1177_v5, %v1025_v6  ;;  %v1280_v8 = vpop.f32.mrb[21].mxu0 }
 0x582   : > { %v1028_v9 = vpop.f32.mrb[22].mxu0 }
 0x583   : > { %v1281_v10 = vpop.f32.mrb[23].mxu0  ;;  %1031 = vst.msk [vmem:[%s336_s10] sm:$0xff] %vm366_vm1, %v1026_v7 }
 0x584   : > { %1502 = shalt.err (!%p1499_p11)
}
 0x585   : > { %s1503_s21 = scalar_lea.hbm %s1926_s30, 128  ;;  %s1507_s24 = scalar_lea.hbm %s1983_s7, 256 }
 0x586   : > { %p1504_p0 = scmp.ne.s32.totalorder %s1926_s30, %s1503_s21  ;;  %p1508_p6 = scmp.lt.u32.totalorder %s1926_s30, %s1983_s7 }
 0x587   : > { %p1509_p7 = scmp.lt.u32.totalorder %s1507_s24, %s1503_s21  ;;  %p1511_p8 = scmp.lt.u32.totalorder %s1503_s21, %s1926_s30 }
 0x588   : > { %p1505_p4 = pnand %p1504_p0, %p2002_p2 }
 0x589   : > { %p1510_p12 = por %p1509_p7, %p1508_p6 }
 0x58a   : > { %p1506_p13 = pneg %p1505_p4 }
 0x58b   : > { %p1512_p1 = por %p1511_p8, %p1510_p12 }
 0x58d   : > { %p1513_p10 = pnand %p1512_p1, %p1506_p13 }
 0x58f   : > { %1516 = shalt.err (!%p1513_p10)
}
 0x590   : > { %1292 = dma.vmem_to_hbm [thread:$0]  (%p2002_p2), %s1928_s22, 128, %s1926_s30, %s1033_s27  }
 0x591 PF: > { %s2003_s10 = sld [smem:[#allocation13_spill]]  ;;  %s2004_s18 = sld [smem:[#allocation14_spill]] }
 0x592   : > { %p2006_p5 = scmp.ge.s32.totalorder %s1575_s29, 2 }
 0x597   : > { %s1059_s17 = sand.u32 1, %s2003_s10   ;;  %p2005_p3 = scmp.ne.s32.totalorder %s2004_s18, 0 }
 0x598   : > { %s1060_s8 = scalar_lea.sflag [#allocation5], %s1059_s17 }
 0x599   : > { %p1306_p9 = pnand %p2006_p5, %p2005_p3 }
 0x59b   : > { %1550 = dma.done.wait (!%p1306_p9), %s1060_s8, 128  }
 0x59c   : > { %1552 = vsyncadd (!%p1306_p9), %s1060_s8, 4294967168  ;;  %s24_s29 = sadd.s32 1, %s1575_s29   ;;  %s2007_s24 = smov %s1559_s25 }
 0x59d   : > { %p21_p11 = scmp.ge.s32.totalorder %s24_s29, 4   ;;  %s2008_s25 = smov %s1563_s26 }
 0x59e   : > { %s2009_s26 = smov %s1778_s19  ;;  %s2010_s27 = smov %s1571_s28 }
 0x59f   : > { %s2011_s28 = smov %s2013_s20  ;;  %23 = sbr.rel (!%p21_p11) target bundleno = 7 (0x7), region = 106 }
 0x5a6   :  { %1065 = vsyncpa [#allocation4], 1 }
 0x5a7   :  { %1067 = vsyncpa [#allocation4 + $0x1], 1 }
 0x5a8   :  { %1068 = vsyncpa [#allocation7], 1 }
 0x5a9   :  { %1069 = vsyncpa [#allocation5], 1 }
 0x5aa   :  { %1071 = vsyncpa [#allocation5 + $0x1], 1 }

// kernel: tpu_custom_call.1
= control target key start
LH: loop header
LB: loop body
LE: loop exit
PB: predicated region body
PF: predicated region fallthrough
CT: control target
= control target key end

     0   :  { %12 = vsyncpa [#allocation4], 0  ;;  %s1976_s0 = inlined_call_operand.hbm [shape: bf16[2,8,32], index: 0, kind: input, shape index: {}]   ;;  %s1977_s1 = inlined_call_operand.hbm [shape: bf16[32,32], index: 1, kind: input, shape index: {}]   ;;  %s1978_s2 = inlined_call_operand.vmem [shape: f32[1,32], index: 2, kind: input, shape index: {}]   ;;  %s1979_s3 = inlined_call_operand.hbm [shape: bf16[32,64], index: 3, kind: input, shape index: {}]   ;;  %s1980_s4 = inlined_call_operand.vmem [shape: f32[1,64], index: 4, kind: input, shape index: {}]   ;;  %s1981_s5 = inlined_call_operand.vmem [shape: bf16[32,32], index: 5, kind: input, shape index: {}]   ;;  %s1982_s6 = inlined_call_operand.vmem [shape: f32[1,32], index: 6, kind: input, shape index: {}]   ;;  %s1983_s7 = inlined_call_operand.hbm [shape: f32[2,8,32], index: 7, kind: output, shape index: {}]  }
   0x1   :  { %14 = vsyncpa [#allocation4 + $0x1], 0 }
   0x2   :  { %15 = vsyncpa [#allocation7], 0 }
   0x3   :  { %16 = vsyncpa [#allocation5], 0 }
   0x4   :  { %18 = vsyncpa [#allocation5 + $0x1], 0  ;;  %s1636_s24 = smov 0   ;;  %s1638_s25 = smov 0  }
   0x5   :  { %s1640_s26 = smov 0   ;;  %s1642_s27 = smov 0  }
   0x6   :  { %s1644_s28 = smov 0   ;;  %s1646_s29 = smov 0  }
   0x7 LB: > { %1990 = sst [smem:[#allocation13_spill]] %s1555_s24  ;;  %s1147_s30 = sadd.s32 4294967295, %s1575_s29   ;;  %s1575_s29 = sphi %s1646_s29, %s24_s29   ;;  %s1571_s28 = sphi %s1644_s28, %s2011_s28   ;;  %s1567_s27 = sphi %s1642_s27, %s2010_s27   ;;  %s1563_s26 = sphi %s1640_s26, %s2009_s26   ;;  %s1559_s25 = sphi %s1638_s25, %s2008_s25   ;;  %s1555_s24 = sphi %s1636_s24, %s2007_s24  }
   0x8   : > { %s1148_s8 = sadd.s32 4294967294, %s1575_s29   ;;  %p56_p0 = scmp.ne.s32.totalorder %s1559_s25, %s1555_s24 }
   0x9   : > { %p1670_p1 = scmp.eq.s32.totalorder %s1147_s30, 0  ;;  %p1674_p2 = scmp.eq.s32.totalorder %s1147_s30, 1 }
   0xa   : > { %p214_p3 = scmp.eq.s32.totalorder %s1148_s8, 1  ;;  %p1149_p5 = scmp.ge.s32.totalorder %s1575_s29, 1 }
   0xb   : > { %s1991_s9 = scalar_select %p1670_p1, 1, 0 }
   0xc   : > { %p1680_p4 = por %p1670_p1, %p56_p0  ;;  %p1685_p6 = por %p214_p3, %p56_p0 }
   0xd   : > { %p221_p7 = scmp.lt.s32.totalorder %s1575_s29, 3  ;;  %s1577_s14 = smov [#allocation6]  }
   0xe   : > { %s1993_s11 = scalar_select %p1680_p4, 1, 0 }
   0xf   : > { %s1994_s12 = scalar_select %p1685_p6, 1, 0 }
  0x10   : > { %p1690_p8 = pnand %p1149_p5, %p221_p7  ;;  %s233_s15 = sshll.u32 %s1577_s14, 4  ;;  %s1694_s15 = int_to_ptr.vmem [resolvable:$true] %s233_s15 }
  0x11   : > { %1995 = sst [smem:[#allocation14_spill]] %s1994_s12  ;;  %s1578_s17 = smov [#allocation8]  }
  0x12   : > { %p1294_p9 = pneg %p1690_p8  ;;  %s249_s18 = sshll.u32 %s1578_s17, 4  ;;  %s1705_s18 = int_to_ptr.vmem [resolvable:$true] %s249_s18 }
  0x13   : > { %s1403_s21 = scalar_lea.hbm %s1977_s1, 256 }
  0x14   : > { %p1701_p11 = pnand %p1294_p9, %p1670_p1  ;;  %p1404_p12 = scmp.ne.s32.totalorder %s1977_s1, %s1403_s21 }
  0x15   : > { %p1410_p5 = scmp.lt.u32.totalorder %s1403_s21, %s1977_s1 }
  0x16   : > { %p1405_p13 = pneg %p1701_p11 }
  0x18   : > { %p1406_p0 = pnand %p1405_p13, %p1404_p12 }
  0x1a   : > { %p1407_p3 = pneg %p1406_p0 }
  0x1c   : > { %p1412_p7 = pnand %p1410_p5, %p1407_p3 }
  0x1e   : > { %1415 = shalt.err (!%p1412_p7)
}
  0x1f   : > { %s1416_s14 = scalar_lea.vmem %s1694_s15, 256  ;;  %p1424_p1 = scmp.lt.s32.totalorder %s1694_s15, %s1694_s15 }
  0x20   : > { %p1417_p9 = scmp.ne.s32.totalorder %s1694_s15, %s1416_s14  ;;  %p1425_p12 = scmp.lt.s32.totalorder %s1416_s14, %s1416_s14 }
  0x22   : > { %p1419_p10 = pnand %p1417_p9, %p1405_p13  ;;  %p1426_p0 = por %p1425_p12, %p1424_p1 }
  0x24   : > { %p1420_p6 = pneg %p1419_p10 }
  0x26   : > { %p1427_p4 = pnand %p1426_p0, %p1420_p6 }
  0x28   : > { %1430 = shalt.err (!%p1427_p4)
}
  0x29   : > { %s1579_s17 = smov 64   ;;  %s1580_s19 = smov 4  }
  0x2a   : > { %1297 = dma.hbm_to_vmem [thread:$0]  (!%p1701_p11), %s1977_s1, 256, %s1694_s15, [#allocation7], %s1579_s17, %s1579_s17, %s1580_s19  }
  0x2b   : > { %s1431_s30 = scalar_lea.hbm %s1979_s3, 256 }
  0x2c   : > { %p1432_p1 = scmp.ne.s32.totalorder %s1979_s3, %s1431_s30  ;;  %p1438_p10 = scmp.lt.u32.totalorder %s1431_s30, %s1979_s3 }
  0x2e   : > { %p1434_p4 = pnand %p1432_p1, %p1405_p13 }
  0x30   : > { %p1435_p6 = pneg %p1434_p4 }
  0x32   : > { %p1440_p3 = pnand %p1438_p10, %p1435_p6 }
  0x34   : > { %1443 = shalt.err (!%p1440_p3)
}
  0x35   : > { %s1444_s15 = scalar_lea.vmem %s1705_s18, 256  ;;  %p1452_p12 = scmp.lt.s32.totalorder %s1705_s18, %s1705_s18 }
  0x36   : > { %p1445_p5 = scmp.ne.s32.totalorder %s1705_s18, %s1444_s15  ;;  %p1453_p0 = scmp.lt.s32.totalorder %s1444_s15, %s1444_s15 }
  0x38   : > { %p1447_p7 = pnand %p1445_p5, %p1405_p13  ;;  %p1454_p1 = por %p1453_p0, %p1452_p12 }
  0x3a   : > { %p1448_p9 = pneg %p1447_p7 }
  0x3c   : > { %p1455_p4 = pnand %p1454_p1, %p1448_p9 }
  0x3e   : > { %1458 = shalt.err (!%p1455_p4)
}
  0x3f   : > { %1300 = dma.hbm_to_vmem [thread:$0]  (!%p1701_p11), %s1979_s3, 256, %s1705_s18, [#allocation7], %s1579_s17, %s1579_s17, %s1580_s19  }
  0x40   : > { %s36_s20 = sadd.s32 1, %s1571_s28  ;;  %s43_s21 = sadd.s32 1, %s1563_s26 }
  0x41   : > { %p38_p13 = scmp.ge.s32.totalorder %s36_s20, 2  ;;  %p50_p6 = scmp.ne.s32.totalorder %s1563_s26, %s1559_s25 }
  0x42   : > { %p51_p10 = scmp.eq.s32.totalorder %s1575_s29, 0  ;;  %p1311_p3 = scmp.lt.s32.totalorder %s1575_s29, 2 }
  0x43   : > { %s2013_s20 = smov (%p38_p13, %s36_s20), 0  ;;  %p1769_p7 = por %p1674_p2, %p50_p6 }
  0x44   : > { %p52_p5 = por %p51_p10, %p50_p6  ;;  %s40_s22 = ssub.s32 %s1571_s28, %s2013_s20 }
  0x45   : > { %s1998_s16 = scalar_select %p1769_p7, 1, 0 }
  0x46   : > { %s272_s23 = sand.u32 1, %s1563_s26   ;;  %p41_p9 = scmp.eq.s32.totalorder %s40_s22, 0 }
  0x47   : > { %s1153_s18 = sshll.u32 %s272_s23, 2  ;;  %s1154_s17 = sshll.u32 %s1571_s28, 6 }
  0x48   : > { %s1778_s19 = scalar_select %p41_p9, %s1563_s26, %s43_s21  }
  0x49   : > { %s1783_s14 = scalar_lea.hbm %s1976_s0, %s1154_s17  ;;  %s276_s10 = scalar_lea.vmem [#allocation3], %s1153_s18 }
  0x4a   : > { %s283_s15 = sshll.u32 %s276_s10, 4  ;;  %p1787_p2 = pnand %p1311_p3, %p52_p5  ;;  %s1791_s15 = int_to_ptr.vmem [resolvable:$true] %s283_s15 }
  0x4b   : > { %s273_s12 = scalar_lea.sflag [#allocation4], %s272_s23  ;;  %s1459_s21 = scalar_lea.hbm %s1783_s14, 64 }
  0x4c   : > { %p1460_p11 = scmp.ne.s32.totalorder %s1783_s14, %s1459_s21  ;;  %p1461_p12 = pneg %p1787_p2 }
  0x4d   : > { %s1464_s17 = scalar_lea.hbm %s1976_s0, 128  ;;  %p1465_p4 = scmp.lt.u32.totalorder %s1783_s14, %s1976_s0 }
  0x4e   : > { %p1462_p0 = pnand %p1461_p12, %p1460_p11  ;;  %p1466_p13 = scmp.lt.u32.totalorder %s1464_s17, %s1459_s21 }
  0x4f   : > { %p1468_p10 = scmp.lt.u32.totalorder %s1459_s21, %s1783_s14 }
  0x50   : > { %p1463_p1 = pneg %p1462_p0  ;;  %p1467_p6 = por %p1466_p13, %p1465_p4 }
  0x52   : > { %p1469_p3 = por %p1468_p10, %p1467_p6 }
  0x54   : > { %p1470_p5 = pnand %p1469_p3, %p1463_p1 }
  0x56   : > { %1473 = shalt.err (!%p1470_p5)
}
  0x57   : > { %s1474_s23 = scalar_lea.vmem %s1791_s15, 64  ;;  %s1581_s10 = smov [#allocation3]  }
  0x58   : > { %p1475_p9 = scmp.ne.s32.totalorder %s1791_s15, %s1474_s23  ;;  %s1479_s22 = sshll.u32 %s1581_s10, 4  ;;  %s1480_s22 = int_to_ptr.vmem [resolvable:$false] %s1479_s22 }
  0x59   : > { %s1481_s18 = scalar_lea.vmem %s1480_s22, 128  ;;  %p1482_p7 = scmp.lt.s32.totalorder %s1791_s15, %s1480_s22 }
  0x5a   : > { %p1477_p11 = pnand %p1475_p9, %p1461_p12  ;;  %p1483_p4 = scmp.lt.s32.totalorder %s1481_s18, %s1474_s23 }
  0x5c   : > { %p1478_p0 = pneg %p1477_p11  ;;  %p1484_p13 = por %p1483_p4, %p1482_p7 }
  0x5e   : > { %p1485_p6 = pnand %p1484_p13, %p1478_p0 }
  0x60   : > { %1488 = shalt.err (!%p1485_p6)
}
  0x61   : > { %1304 = dma.hbm_to_vmem [thread:$0]  (!%p1787_p2), %s1783_s14, 64, %s1791_s15, %s273_s12  }
  0x62   : > { %292 = sbr.rel (%p1690_p8) target bundleno = 1425 (0x591), region = 48  ;;  %s1821_s21 = sand.u32 (!%p1690_p8), 1, %s1559_s25  }
  0x63   : > { %s1156_s17 = sshll.u32 (!%p1690_p8), %s1821_s21, 2  ;;  %s295_s30 = scalar_lea.sflag (!%p1690_p8), [#allocation4], %s1821_s21 }
  0x64   : > { %s298_s8 = scalar_lea.vmem (!%p1690_p8), [#allocation3], %s1156_s17  ;;  %p2000_p7 = scmp.ne.s32.totalorder (!%p1690_p8), %s1993_s11, 0 }
  0x69   : > { %1542 = dma.done.wait (%p2000_p7), %s295_s30, 64  }
  0x6a   : > { %1544 = vsyncadd (%p2000_p7), %s295_s30, 4294967232  ;;  %p2001_p12 = scmp.ne.s32.totalorder %s1991_s9, 0 }
  0x6c   : > { %1546 = dma.done.wait (%p2001_p12), [#allocation7], 512  }
  0x6d   : > { %1548 = vsyncadd (%p2001_p12), [#allocation7], 4294966784  ;;  %v1582_v0 = vmov 0.0   ;;  %vm1583_vm0 = vmmov 0   ;;  %v1380_v1 = vld [vmem:[#allocation8] sm:$0xff]   ;;  %v1381_v2 = vld [vmem:[#allocation8 + $0x8] sm:$0xff]   ;;  %v410_v7 = vlaneseq }
  0x6e   : > { %1210 = vmatprep.subr.bf16.mxu0 %v1582_v0  ;;  %1214 = vmatprep.mubr.msk.bf16.mxu0 %vm1583_vm0, %v1582_v0  ;;  %v1382_v3 = vld [vmem:[#allocation6] sm:$0xff]   ;;  %v1383_v4 = vld [vmem:[#allocation6 + $0x8] sm:$0xff]   ;;  %v342_v5 = vld [vmem:[%s298_s8] sm:$0xf]  ;;  %vm366_vm1 = vcmask 261120   ;;  %v1584_v12 = vmov 1.0  }
  0x6f   : > { %1218 = vmatprep.subr.bf16.mxu1 %v1582_v0  ;;  %1222 = vmatprep.mubr.msk.bf16.mxu1 %vm1583_vm0, %v1582_v0  ;;  %v431_v6 = vld [vmem:[%s298_s8] sm:$0xf]  ;;  %v411_v8 = vshrl.u32 %v410_v7, 7  ;;  %v413_v9 = vand.u32 127, %v410_v7  ;;  %v1160_v10 = vld [vmem:[%s1980_s4] ss:$0 sm:$0xff] }
  0x70   : > { %1211 = vmatpush3.bf16.msra.mxu0 %v1380_v1  ;;  %1219 = vmatpush3.bf16.msra.mxu1 %v1382_v3  ;;  %vm424_vm5 = vcmask 519168   ;;  %v1164_v23 = vld [vmem:[%s1978_s2] ss:$0 sm:$0xff]  ;;  %vm502_vm6 = vcmask 64512   ;;  %s1585_s15 = smov 112   ;;  %s1586_s24 = smov 120  }
  0x71   : > { %1212 = vmatprep.subr.bf16.mxu0 %v1582_v0  ;;  %1220 = vmatprep.subr.bf16.mxu1 %v1582_v0  ;;  %vm414_vm2 = vcmp.eq.s32.totalorder %v411_v8, 0  ;;  %vm415_vm3 = vcmp.ge.s32.totalorder %v413_v9, 32  ;;  %s1587_s12 = smov 104   ;;  %s1588_s23 = smov 96   ;;  %vm567_vm7 = vcmask 1043456   ;;  %vm960_vm8 = vcmask 130048  }
  0x72   : > { %vm420_vm4 = vmand %vm414_vm2, %vm415_vm3  ;;  %s1589_s10 = smov 80   ;;  %s1590_s22 = smov 72   ;;  %vm963_vm9 = vcmask 195584  }
  0x73   : > { %v421_v13 = vsel %vm420_vm4, 0.5, %v1584_v12  ;;  %s1591_s18 = smov 88   ;;  %s1592_s11 = smov 8  }
  0x74   : > { %1213 = vmatpush3.bf16.msra.mxu0 %v1381_v2  ;;  %1221 = vmatpush3.bf16.msra.mxu1 %v1383_v4  ;;  %s1593_s13 = smov 16   ;;  %s1594_s14 = smov 24  }
  0x75   : > { %1226 = vmatprep.subr.bf16.mxu0 %v1582_v0  ;;  %1232 = vmatprep.subr.bf16.mxu1 %v1582_v0  ;;  %p2002_p2 = scmp.ne.s32.totalorder %s1998_s16, 0  ;;  %s1595_s9 = smov [#allocation9]  }
  0x77   : > { %1215 = vmatmul.mubr.msk.bf16.vlgmr.msra.gmra.mrb[0].mxu0 %vm366_vm1, %v342_v5  ;;  %1223 = vmatmul.mubr.msk.bf16.vlgmr.msra.gmra.mrb[0].mxu1 %vm366_vm1, %v431_v6 }
  0x78   : > { %1228 = vmatprep.mubr.msk.bf16.mxu0 %vm1583_vm0, %v1582_v0  ;;  %1234 = vmatprep.mubr.msk.bf16.mxu1 %vm1583_vm0, %v1582_v0 }
 0x14a   : > { %v404_v11 = vpop.f32.mrb[0].mxu0  ;;  %v493_v19 = vpop.f32.mrb[0].mxu1 }
 0x14b   : > { %v405_v14 = vadd.f32 %v1160_v10, %v404_v11  ;;  %v1216_v15 = vpop.f32.mrb[1].mxu0  ;;  %v1224_v20 = vpop.f32.mrb[1].mxu1  ;;  %v494_v25 = vadd.f32 %v1164_v23, %v493_v19 }
 0x14c   : > { %v407_v16 = vpop.f32.mrb[2].mxu0  ;;  %v496_v22 = vpop.f32.mrb[2].mxu1 }
 0x14d   : > { %v422_v17 = vmul.f32 %v421_v13, %v405_v14  ;;  %v1217_v18 = vpop.f32.mrb[3].mxu0  ;;  %v1225_v24 = vpop.f32.mrb[3].mxu1  ;;  %v499_v26 = vmul.f32 0.35355338, %v494_v25 }
 0x14f   : > { %v423_v21 = vpack.c.bf16 %v422_v17, %v422_v17  ;;  %v500_v30 = vpack.c.bf16 %v499_v26, %v499_v26 }
 0x151   : > { %425 = vst.msk [vmem:[#allocation2] sm:$0xf] %vm424_vm5, %v423_v21 }
 0x158   : > { %v501_v27 = vld [vmem:[#allocation2] sm:$0xf] }
 0x159   : > { %v507_v28 = vsel %vm502_vm6, %v501_v27, 0  ;;  %v1856_v29 = vcombine.low %v501_v27, %v501_v27 }
 0x15a   : > { %1227 = vmatpush3.bf16.xpose.msra.mxu0 %v507_v28 }
 0x15b   : > { %728 = vrot.lane.b32.xlu1 %v1856_v29, %s1585_s15  ;;  %617 = vrot.lane.b32.xlu0 %v1856_v29, %s1586_s24 }
 0x15c   : > { %1238 = vmatprep.subr.bf16.mxu0 %v1582_v0 }
 0x15f   : > { %726 = vrot.lane.b32.xlu1 %v500_v30, %s1585_s15  ;;  %615 = vrot.lane.b32.xlu0 %v500_v30, %s1586_s24  ;;  %s1159_s15 = sshll.u32 %s1821_s21, 3 }
 0x161   : > { %1229 = vmatmul.mubr.msk.bf16.vlgmr.msra.gmra.mrb[4].mxu0 %vm502_vm6, %v500_v30 }
 0x162   : > { %1240 = vmatprep.mubr.msk.bf16.mxu0 %vm1583_vm0, %v1582_v0 }
 0x163   : > { %837 = vrot.lane.b32.xlu1 %v500_v30, %s1587_s12  ;;  %839 = vrot.lane.b32.xlu0 %v1856_v29, %s1587_s12 }
 0x167   : > { %562 = vrot.lane.b32.xlu1 %v1856_v29, %s1588_s23  ;;  %s1182_s23 = sshll.u32 %s1567_s27, 7  ;;  %s1033_s27 = scalar_lea.sflag [#allocation5], %s1821_s21 }
 0x168   : > { %s1926_s30 = scalar_lea.hbm %s1983_s7, %s1182_s23 }
 0x1cd   : > { %v729_v31 = vpop.permute.xlu1 %728  ;;  %v618_v32 = vpop.permute.xlu0 %617 }
 0x1ce   : > { %v623_v33 = vsel %vm502_vm6, %v618_v32, 0  ;;  %v734_v37 = vsel %vm502_vm6, %v729_v31, 0 }
 0x1cf   : > { %1239 = vmatpush3.bf16.xpose.msra.mxu0 %v623_v33 }
 0x1d0   : > { %1250 = vmatprep.subr.bf16.mxu0 %v1582_v0 }
 0x1d1   : > { %v727_v34 = vpop.permute.xlu1 %726  ;;  %v616_v35 = vpop.permute.xlu0 %615 }
 0x1d5   : > { %v838_v36 = vpop.permute.xlu1 %837  ;;  %v840_v40 = vpop.permute.xlu0 %839 }
 0x1d6   : > { %1241 = vmatmul.mubr.msk.bf16.vlgmr.msra.gmra.mrb[8].mxu0 %vm502_vm6, %v616_v35  ;;  %v845_v41 = vsel %vm502_vm6, %v840_v40, 0 }
 0x1d7   : > { %1251 = vmatpush3.bf16.xpose.msra.mxu0 %v734_v37  ;;  %1252 = vmatprep.mubr.msk.bf16.mxu0 %vm1583_vm0, %v1582_v0  ;;  %v1385_v37 = vld [vmem:[%s1981_s5] sm:$0xff]  }
 0x1d8   : > { %1262 = vmatprep.subr.bf16.mxu0 %v1582_v0 }
 0x1d9   : > { %v563_v38 = vpop.permute.xlu1 %562 }
 0x1da   : > { %v569_v39 = vsel %vm567_vm7, %v563_v38, 0 }
 0x1db   : > { %1233 = vmatpush3.bf16.msra.mxu1 %v569_v39 }
 0x1dc   : > { %1244 = vmatprep.subr.bf16.mxu1 %v1582_v0 }
 0x1de   : > { %1253 = vmatmul.mubr.msk.bf16.vlgmr.msra.gmra.mrb[12].mxu0 %vm502_vm6, %v727_v34 }
 0x1df   : > { %1263 = vmatpush3.bf16.xpose.msra.mxu0 %v845_v41  ;;  %1264 = vmatprep.mubr.msk.bf16.mxu0 %vm1583_vm0, %v1582_v0  ;;  %v1386_v41 = vld [vmem:[%s1981_s5 + $0x8] sm:$0xff]  }
 0x1e0   : > { %1274 = vmatprep.subr.bf16.mxu0 %v1582_v0 }
 0x1e6   : > { %1265 = vmatmul.mubr.msk.bf16.vlgmr.msra.gmra.mrb[16].mxu0 %vm502_vm6, %v838_v36 }
 0x1e7   : > { %1278 = vmatprep.mubr.msk.bf16.mxu0 %vm1583_vm0, %v1582_v0  ;;  %1275 = vmatpush3.bf16.msra.mxu0 %v1385_v37 }
 0x1e8   : > { %1276 = vmatprep.subr.bf16.mxu0 %v1582_v0 }
 0x1eb   : > { %1277 = vmatpush3.bf16.msra.mxu0 %v1386_v41 }
 0x234   : > { %v543_v42 = vpop.f32.mrb[4].mxu0 }
 0x235   : > { %v1230_v43 = vpop.f32.mrb[5].mxu0  ;;  %v549_v44 = vsel %vm502_vm6, %v543_v42, -inf }
 0x236   : > { %550 = vmax.xlane.f32.xlu0 %v549_v44  ;;  %v546_v45 = vpop.f32.mrb[6].mxu0 }
 0x237   : > { %v1231_v46 = vpop.f32.mrb[7].mxu0 }
 0x2a9   : > { %v659_v47 = vpop.f32.mrb[8].mxu0 }
 0x2aa   : > { %v1242_v48 = vpop.f32.mrb[9].mxu0  ;;  %v665_v49 = vsel %vm502_vm6, %v659_v47, -inf }
 0x2ab   : > { %666 = vmax.xlane.f32.xlu1 %v665_v49  ;;  %v662_v50 = vpop.f32.mrb[10].mxu0 }
 0x2ac   : > { %v1243_v51 = vpop.f32.mrb[11].mxu0 }
 0x2b1   : > { %v770_v52 = vpop.f32.mrb[12].mxu0 }
 0x2b2   : > { %v1254_v53 = vpop.f32.mrb[13].mxu0  ;;  %v776_v54 = vsel %vm502_vm6, %v770_v52, -inf }
 0x2b3   : > { %777 = vmax.xlane.f32.xlu0 %v776_v54  ;;  %v773_v55 = vpop.f32.mrb[14].mxu0 }
 0x2b4   : > { %v1255_v56 = vpop.f32.mrb[15].mxu0 }
 0x2b9   : > { %v881_v57 = vpop.f32.mrb[16].mxu0 }
 0x2ba   : > { %v1266_v58 = vpop.f32.mrb[17].mxu0  ;;  %v887_v59 = vsel %vm502_vm6, %v881_v57, -inf }
 0x2bb   : > { %888 = vmax.xlane.f32.xlu0 %v887_v59  ;;  %v884_v60 = vpop.f32.mrb[18].mxu0 }
 0x2bc   : > { %786 = vrot.lane.b32.xlu1 %v1856_v29, %s1589_s10  ;;  %v1267_v61 = vpop.f32.mrb[19].mxu0  ;;  %s336_s10 = scalar_lea.vmem [#allocation9], %s1159_s15 }
 0x2c0   : > { %897 = vrot.lane.b32.xlu1 %v1856_v29, %s1590_s22  ;;  %s1047_s22 = sshll.u32 %s336_s10, 4  ;;  %s1928_s22 = int_to_ptr.vmem [resolvable:$true] %s1047_s22 }
 0x2c1   : > { %s1489_s8 = scalar_lea.vmem %s1928_s22, 128 }
 0x2c2   : > { %p1490_p8 = scmp.ne.s32.totalorder %s1928_s22, %s1489_s8 }
 0x2c3   : > { %v551_v62 = vpop.xlane.xlu0 %550 }
 0x2c4   : > { %v552_v63 = vsub.f32 %v543_v42, %v551_v62  ;;  %p1491_p1 = pnand %p1490_p8, %p2002_p2 }
 0x2c6   : > { %v553_v1 = vmul.f32 1.442695, %v552_v63  ;;  %p1492_p10 = pneg %p1491_p1 }
 0x2c8   : > { %1387 = vpow2.f32 %v553_v1 }
 0x2d1   : > { %675 = vrot.lane.b32.xlu0 %v1856_v29, %s1591_s18 }
 0x2d2   : > { %v1388_v2 = vpop.eup %1387 }
 0x2d3   : > { %v558_v3 = vpack.c.bf16 %v1388_v2, %v1388_v2  ;;  %v555_v27 = vsel %vm502_vm6, %v1388_v2, 0.0 }
 0x2d5   : > { %1235 = vmatmul.mubr.msk.bf16.vlgmr.msra.gmra.mrb[4].mxu1 %vm502_vm6, %v558_v3 }
 0x2d6   : > { %1246 = vmatprep.mubr.msk.bf16.mxu1 %vm1583_vm0, %v1582_v0 }
 0x338   : > { %v667_v4 = vpop.xlane.xlu1 %666 }
 0x339   : > { %v668_v5 = vsub.f32 %v659_v47, %v667_v4 }
 0x33b   : > { %v669_v6 = vmul.f32 1.442695, %v668_v5  ;;  %v1177_v5 = vld [vmem:[%s1982_s6] ss:$0 sm:$0xff] }
 0x33c   : > { %v787_v17 = vpop.permute.xlu1 %786 }
 0x33d   : > { %1389 = vpow2.f32 %v669_v6  ;;  %v792_v21 = vsel %vm567_vm7, %v787_v17, 0 }
 0x340   : > { %v778_v7 = vpop.xlane.xlu0 %777  ;;  %v898_v22 = vpop.permute.xlu1 %897 }
 0x341   : > { %v779_v8 = vsub.f32 %v770_v52, %v778_v7  ;;  %v903_v26 = vsel %vm567_vm7, %v898_v22, 0 }
 0x343   : > { %v780_v9 = vmul.f32 1.442695, %v779_v8 }
 0x345   : > { %1391 = vpow2.f32 %v780_v9 }
 0x347   : > { %v1390_v10 = vpop.eup %1389 }
 0x348   : > { %v889_v11 = vpop.xlane.xlu0 %888  ;;  %v671_v12 = vsel %vm502_vm6, %v1390_v10, 0.0  ;;  %v674_v19 = vpack.c.bf16 %v1390_v10, %v1390_v10 }
 0x349   : > { %v890_v13 = vsub.f32 %v881_v57, %v889_v11  ;;  %672 = vadd.xlane.f32.xlu0 %v671_v12 }
 0x34b   : > { %v891_v14 = vmul.f32 1.442695, %v890_v13 }
 0x34c   : > { %v676_v15 = vpop.permute.xlu0 %675 }
 0x34d   : > { %1393 = vpow2.f32 %v891_v14  ;;  %v681_v16 = vsel %vm567_vm7, %v676_v15, 0 }
 0x34e   : > { %1245 = vmatpush3.bf16.msra.mxu1 %v681_v16 }
 0x34f   : > { %v1392_v18 = vpop.eup %1391  ;;  %1256 = vmatprep.subr.bf16.mxu1 %v1582_v0 }
 0x350   : > { %v782_v20 = vsel %vm502_vm6, %v1392_v18, 0.0  ;;  %v785_v24 = vpack.c.bf16 %v1392_v18, %v1392_v18 }
 0x351   : > { %783 = vadd.xlane.f32.xlu1 %v782_v20  ;;  %1247 = vmatmul.mubr.msk.bf16.vlgmr.msra.gmra.mrb[8].mxu1 %vm502_vm6, %v674_v19 }
 0x352   : > { %1257 = vmatpush3.bf16.msra.mxu1 %v792_v21  ;;  %1258 = vmatprep.mubr.msk.bf16.mxu1 %vm1583_vm0, %v1582_v0 }
 0x353   : > { %1268 = vmatprep.subr.bf16.mxu1 %v1582_v0 }
 0x357   : > { %v1394_v23 = vpop.eup %1393 }
 0x358   : > { %v893_v25 = vsel %vm502_vm6, %v1394_v23, 0.0  ;;  %v896_v28 = vpack.c.bf16 %v1394_v23, %v1394_v23 }
 0x359   : > { %894 = vadd.xlane.f32.xlu0 %v893_v25  ;;  %1259 = vmatmul.mubr.msk.bf16.vlgmr.msra.gmra.mrb[12].mxu1 %vm502_vm6, %v785_v24 }
 0x35a   : > { %1269 = vmatpush3.bf16.msra.mxu1 %v903_v26  ;;  %1270 = vmatprep.mubr.msk.bf16.mxu1 %vm1583_vm0, %v1582_v0 }
 0x35d   : > { %556 = vadd.xlane.f32.xlu0 %v555_v27 }
 0x361   : > { %1271 = vmatmul.mubr.msk.bf16.vlgmr.msra.gmra.mrb[16].mxu1 %vm502_vm6, %v896_v28 }
 0x3a8   : > { %v605_v29 = vpop.f32.mrb[4].mxu1 }
 0x3a9   : > { %v1236_v30 = vpop.f32.mrb[5].mxu1 }
 0x3aa   : > { %v608_v31 = vpop.f32.mrb[6].mxu1 }
 0x3ab   : > { %v1237_v32 = vpop.f32.mrb[7].mxu1 }
 0x3d6   : > { %v673_v33 = vpop.xlane.xlu0 %672 }
 0x3d7   : > { %1395 = vrcp.f32 %v673_v33 }
 0x3de   : > { %v784_v34 = vpop.xlane.xlu1 %783 }
 0x3df   : > { %1397 = vrcp.f32 %v784_v34 }
 0x3e1   : > { %v1396_v35 = vpop.eup %1395 }
 0x3e6   : > { %v895_v42 = vpop.xlane.xlu0 %894 }
 0x3e7   : > { %1399 = vrcp.f32 %v895_v42 }
 0x3e9   : > { %v1398_v45 = vpop.eup %1397 }
 0x3ea   : > { %v557_v58 = vpop.xlane.xlu0 %556 }
 0x3eb   : > { %1401 = vrcp.f32 %v557_v58 }
 0x3f1   : > { %v1400_v52 = vpop.eup %1399 }
 0x3f5   : > { %v1402_v59 = vpop.eup %1401 }
 0x3f6   : > { %v612_v60 = vmul.f32 %v1402_v59, %v605_v29 }
 0x3f8   : > { %v613_v62 = vpack.c.bf16 %v612_v60, %v612_v60 }
 0x424   : > { %v717_v36 = vpop.f32.mrb[8].mxu1 }
 0x425   : > { %v724_v38 = vmul.f32 %v1396_v35, %v717_v36  ;;  %v1248_v39 = vpop.f32.mrb[9].mxu1 }
 0x426   : > { %v720_v40 = vpop.f32.mrb[10].mxu1 }
 0x427   : > { %v725_v43 = vpack.c.bf16 %v724_v38, %v724_v38  ;;  %v1249_v44 = vpop.f32.mrb[11].mxu1 }
 0x429   : > { %949 = vrot.lane.b32.xlu1 %v725_v43, %s1592_s11  ;;  %s1493_s11 = sshll.u32 %s1595_s9, 4  ;;  %s1494_s11 = int_to_ptr.vmem [resolvable:$false] %s1493_s11 }
 0x42a   : > { %p1496_p3 = scmp.lt.s32.totalorder %s1928_s22, %s1494_s11 }
 0x42c   : > { %v828_v46 = vpop.f32.mrb[12].mxu1 }
 0x42d   : > { %v835_v47 = vmul.f32 %v1398_v45, %v828_v46  ;;  %v1260_v48 = vpop.f32.mrb[13].mxu1 }
 0x42e   : > { %v831_v49 = vpop.f32.mrb[14].mxu1 }
 0x42f   : > { %v836_v50 = vpack.c.bf16 %v835_v47, %v835_v47  ;;  %v1261_v51 = vpop.f32.mrb[15].mxu1 }
 0x431   : > { %952 = vrot.lane.b32.xlu0 %v836_v50, %s1593_s13  ;;  %s1495_s13 = scalar_lea.vmem %s1494_s11, 256 }
 0x432   : > { %p1497_p5 = scmp.lt.s32.totalorder %s1495_s13, %s1489_s8 }
 0x434   : > { %v939_v53 = vpop.f32.mrb[16].mxu1  ;;  %p1498_p9 = por %p1497_p5, %p1496_p3 }
 0x435   : > { %v946_v54 = vmul.f32 %v1400_v52, %v939_v53  ;;  %v1272_v55 = vpop.f32.mrb[17].mxu1 }
 0x436   : > { %v942_v56 = vpop.f32.mrb[18].mxu1  ;;  %p1499_p11 = pnand %p1498_p9, %p1492_p10 }
 0x437   : > { %v947_v57 = vpack.c.bf16 %v946_v54, %v946_v54  ;;  %v1273_v0 = vpop.f32.mrb[19].mxu1 }
 0x439   : > { %955 = vrot.lane.b32.xlu1 %v947_v57, %s1594_s14 }
 0x49b   : > { %v950_v61 = vpop.permute.xlu1 %949 }
 0x49c   : > { %v959_v1 = vsel %vm502_vm6, %v613_v62, %v950_v61 }
 0x4a3   : > { %v953_v63 = vpop.permute.xlu0 %952 }
 0x4a4   : > { %v962_v2 = vsel %vm960_vm8, %v959_v1, %v953_v63 }
 0x4ab   : > { %v956_v3 = vpop.permute.xlu1 %955 }
 0x4ac   : > { %v965_v4 = vsel %vm963_vm9, %v962_v2, %v956_v3 }
 0x4ad   : > { %1279 = vmatmul.mubr.msk.bf16.vlgmr.msra.gmra.mrb[20].mxu0 %vm366_vm1, %v965_v4 }
 0x580   : > { %v1025_v6 = vpop.f32.mrb[20].mxu0 }
 0x581   : > { %v1026_v7 = vadd.f32 %v1177_v5, %v1025_v6  ;;  %v1280_v8 = vpop.f32.mrb[21].mxu0 }
 0x582   : > { %v1028_v9 = vpop.f32.mrb[22].mxu0 }
 0x583   : > { %v1281_v10 = vpop.f32.mrb[23].mxu0  ;;  %1031 = vst.msk [vmem:[%s336_s10] sm:$0xff] %vm366_vm1, %v1026_v7 }
 0x584   : > { %1502 = shalt.err (!%p1499_p11)
}
 0x585   : > { %s1503_s21 = scalar_lea.hbm %s1926_s30, 128  ;;  %s1507_s24 = scalar_lea.hbm %s1983_s7, 256 }
 0x586   : > { %p1504_p0 = scmp.ne.s32.totalorder %s1926_s30, %s1503_s21  ;;  %p1508_p6 = scmp.lt.u32.totalorder %s1926_s30, %s1983_s7 }
 0x587   : > { %p1509_p7 = scmp.lt.u32.totalorder %s1507_s24, %s1503_s21  ;;  %p1511_p8 = scmp.lt.u32.totalorder %s1503_s21, %s1926_s30 }
 0x588   : > { %p1505_p4 = pnand %p1504_p0, %p2002_p2 }
 0x589   : > { %p1510_p12 = por %p1509_p7, %p1508_p6 }
 0x58a   : > { %p1506_p13 = pneg %p1505_p4 }
 0x58b   : > { %p1512_p1 = por %p1511_p8, %p1510_p12 }
 0x58d   : > { %p1513_p10 = pnand %p1512_p1, %p1506_p13 }
 0x58f   : > { %1516 = shalt.err (!%p1513_p10)
}
 0x590   : > { %1292 = dma.vmem_to_hbm [thread:$0]  (%p2002_p2), %s1928_s22, 128, %s1926_s30, %s1033_s27  }
 0x591 PF: > { %s2003_s10 = sld [smem:[#allocation13_spill]]  ;;  %s2004_s18 = sld [smem:[#allocation14_spill]] }
 0x592   : > { %p2006_p5 = scmp.ge.s32.totalorder %s1575_s29, 2 }
 0x597   : > { %s1059_s17 = sand.u32 1, %s2003_s10   ;;  %p2005_p3 = scmp.ne.s32.totalorder %s2004_s18, 0 }
 0x598   : > { %s1060_s8 = scalar_lea.sflag [#allocation5], %s1059_s17 }
 0x599   : > { %p1306_p9 = pnand %p2006_p5, %p2005_p3 }
 0x59b   : > { %1550 = dma.done.wait (!%p1306_p9), %s1060_s8, 128  }
 0x59c   : > { %1552 = vsyncadd (!%p1306_p9), %s1060_s8, 4294967168  ;;  %s24_s29 = sadd.s32 1, %s1575_s29   ;;  %s2007_s24 = smov %s1559_s25 }
 0x59d   : > { %p21_p11 = scmp.ge.s32.totalorder %s24_s29, 4   ;;  %s2008_s25 = smov %s1563_s26 }
 0x59e   : > { %s2009_s26 = smov %s1778_s19  ;;  %s2010_s27 = smov %s1571_s28 }
 0x59f   : > { %s2011_s28 = smov %s2013_s20  ;;  %23 = sbr.rel (!%p21_p11) target bundleno = 7 (0x7), region = 106 }
 0x5a6   :  { %1065 = vsyncpa [#allocation4], 1 }
 0x5a7   :  { %1067 = vsyncpa [#allocation4 + $0x1], 1 }
 0x5a8   :  { %1068 = vsyncpa [#allocation7], 1 }
 0x5a9   :  { %1069 = vsyncpa [#allocation5], 1 }
 0x5aa   :  { %1071 = vsyncpa [#allocation5 + $0x1], 1 }

</bundles_post_ra>
